<compile_context>
chip_gen: v7x
topology: tpu7x:2x2x1
jax: 0.10.0
libtpu: 0.0.40
codegen_flags: <defaults>
</compile_context>

<pallas_src>
import functools

import jax
import jax.numpy as jnp
from jax.experimental import pallas as pl
from jax.experimental.pallas import tpu as pltpu

LANES = 128


# -----------------------------------------------------------------------------
# Fused decoder kernel (one batch tile of Bt elements per grid step)
# -----------------------------------------------------------------------------
def _make_decoder_kernel(Bt, L, C, K, dilations, cout, eps=1e-8):
    """dilations: static per-residual-block dilation (conv1 uses d, conv2 2*d).

    eps=1e-8 matches nn.LayerNorm(out_channel, eps=1e-08) in the module.
    """
    n_blocks = len(dilations)
    pad_max = max((K - 1) * 2 * d for d in dilations)   # conv2 needs the most
    PAD = ((pad_max + 7) // 8) * 8                       # sublane-aligned slab writes
    BL = Bt * L

    def kernel(x_ref, w1_ref, b1_ref, g1_ref, bt1_ref,
               w2_ref, b2_ref, g2_ref, bt2_ref,
               wo_ref, bo_ref, a_ref,
               o_ref, act_ref):
        # Zero the per-element causal left-pad rows once per grid step.
        # Must stay UNconditional: with a "parallel" grid axis each TensorCore
        # has its own scratch instance.
        act_ref[:, 0:PAD, :] = jnp.zeros((Bt, PAD, C), jnp.float32)

        def conv_ln_relu(inp, w_ref, blk, bias, gamma, beta, dil):
            # Stage the conv input; rows [0, PAD) stay zero => causal padding,
            # and each batch element keeps its own pad (no cross-batch bleed).
            act_ref[:, PAD:PAD + L, :] = inp.reshape(Bt, L, C)
            off = PAD - (K - 1) * dil
            # Widened contraction: concat the K shifted taps along channels and
            # issue ONE (Bt*L, K*C) @ (K*C, C) MXU matmul (bf16 in, f32 acc).
            # TODO(synk): off + j*dil is generally not 8-row aligned; a
            # per-conv aligned pad (or pltpu.roll) would remove the sublane
            # relayouts on the tap loads if L*C ever gets large.
            x_cat = jnp.concatenate(
                [act_ref[:, off + j * dil: off + j * dil + L, :]
                 for j in range(K)],
                axis=-1).reshape(BL, K * C)
            acc = jnp.dot(x_cat.astype(jnp.bfloat16), w_ref[blk],
                          preferred_element_type=jnp.float32) + bias
            # Fused LayerNorm(eps=1e-8) epilogue in f32:
            #   var = E[x^2] - mean^2 ;  y = acc * s + (beta - mean * s)
            mean = jnp.mean(acc, axis=-1, keepdims=True)
            var = jnp.maximum(
                jnp.mean(acc * acc, axis=-1, keepdims=True) - mean * mean, 0.0)
            s = gamma * jax.lax.rsqrt(var + eps)
            y = acc * s + (beta - mean * s)
            return jnp.maximum(y, 0.0)            # ReLU (dropout == identity)

        cur = x_ref[...].reshape(BL, C)           # f32 residual stream
        for blk in range(n_blocks):               # static unroll over blocks
            d = dilations[blk]
            out1 = conv_ln_relu(cur, w1_ref, blk, b1_ref[blk], g1_ref[blk],
                                bt1_ref[blk], d)
            out2 = conv_ln_relu(out1, w2_ref, blk, b2_ref[blk], g2_ref[blk],
                                bt2_ref[blk], 2 * d)
            cur = a_ref[blk] * out2 + cur         # learnable residual scale

        # Fused (TCN.output o Decoder.output_projection): a single matmul into
        # a lane-dense 128-wide output slab (extra columns are exactly zero).
        y = jnp.dot(cur.astype(jnp.bfloat16), wo_ref[...],
                    preferred_element_type=jnp.float32) + bo_ref[...]
        o_ref[...] = y.reshape(Bt, L, cout)

    return kernel, PAD


# -----------------------------------------------------------------------------
# Parameter construction (deterministic, synthetic)
# -----------------------------------------------------------------------------
def init_decoder_params(key, feat_num, hidden_dim, block_num, dilations):
    ks = 3  # TCN kwargs path hardcodes kernel_size = 3
    all_dil = list(dilations) * block_num
    params = {"blocks": [], "kernel_size": ks}
    for d in all_dil:
        key, k1, k2 = jax.random.split(key, 3)
        params["blocks"].append({
            "dilation": d,
            # conv weights stored as (k, C_in, C_out)  (== PyTorch w[:, :, 0, j].T)
            "w1": 0.05 * jax.random.normal(k1, (ks, hidden_dim, hidden_dim), jnp.float32),
            "b1": jnp.full((1, hidden_dim), 0.01, jnp.float32),
            "g1": jnp.ones((1, hidden_dim), jnp.float32),
            "beta1": jnp.zeros((1, hidden_dim), jnp.float32),
            "w2": 0.05 * jax.random.normal(k2, (ks, hidden_dim, hidden_dim), jnp.float32),
            "b2": jnp.full((1, hidden_dim), 0.01, jnp.float32),
            "g2": jnp.ones((1, hidden_dim), jnp.float32),
            "beta2": jnp.zeros((1, hidden_dim), jnp.float32),
            "a": jnp.float32(1e-8),  # enable_res_parameter=1, a initialized to 1e-8
        })
    key, k3, k4 = jax.random.split(key, 3)
    # TCN.output : Linear(d_model, d_model) (xavier weight, bias 0.1);
    # Decoder.output_projection : Linear(hidden_dim, feat_num).
    params["out_w"] = 0.05 * jax.random.normal(k3, (hidden_dim, hidden_dim), jnp.float32)
    params["out_b"] = jnp.full((1, hidden_dim), 0.1, jnp.float32)
    params["proj_w"] = 0.05 * jax.random.normal(k4, (hidden_dim, feat_num), jnp.float32)
    params["proj_b"] = jnp.zeros((1, feat_num), jnp.float32)
    return params


def pack_decoder_params(params):
    """One-time packing (stack / pad / fuse linears / bf16-cast) of weights.

    Runs OUTSIDE the jitted forward so per-call cost is zero.
    """
    blocks = params["blocks"]
    K = params["kernel_size"]
    n_blocks = len(blocks)
    C = params["out_w"].shape[0]
    feat_num = params["proj_w"].shape[1]
    cout_pad = ((feat_num + LANES - 1) // LANES) * LANES   # lane-dense out width

    def stack(name):
        return jnp.stack([b[name] for b in blocks])

    # Conv weights (K, C_in, C_out) -> (K*C_in, C_out): tap j occupies rows
    # [j*C, (j+1)*C), matching the in-kernel channel concat of shifted taps.
    w1 = stack("w1").reshape(n_blocks, K * C, C).astype(jnp.bfloat16)
    w2 = stack("w2").reshape(n_blocks, K * C, C).astype(jnp.bfloat16)

    # Fold TCN.output and output_projection into ONE linear (no nonlinearity
    # in between):  (x@Wo + bo)@Wp + bp  ==  x@(Wo@Wp) + (bo@Wp + bp).
    proj_w = jnp.zeros((C, cout_pad), jnp.float32).at[:, :feat_num].set(params["proj_w"])
    proj_b = jnp.zeros((1, cout_pad), jnp.float32).at[:, :feat_num].set(params["proj_b"])
    w_fused = jnp.dot(params["out_w"], proj_w).astype(jnp.bfloat16)
    b_fused = jnp.dot(params["out_b"], proj_w) + proj_b       # f32, (1, cout_pad)

    return {
        "w1": w1, "b1": stack("b1"), "g1": stack("g1"), "bt1": stack("beta1"),
        "w2": w2, "b2": stack("b2"), "g2": stack("g2"), "bt2": stack("beta2"),
        "w_out": w_fused, "b_out": b_fused,
        "a": stack("a").astype(jnp.float32),
        "dilations": tuple(b["dilation"] for b in blocks),
        "kernel_size": K,
        "feat_num": feat_num,
        "cout_pad": cout_pad,
    }


# -----------------------------------------------------------------------------
# Decoder forward: single fused pallas_call over a batch-blocked grid
# -----------------------------------------------------------------------------
def _grid_steps_for_batch(B):
    """v7x has 2 TensorCores/chip -> split the batch across them; single-TC
    chips (v5e/v6e) get one big grid step (every extra step is pure overhead).
    """
    # TODO(synk): if B == 1 on v7x, split along L (with a pad_max halo) instead.
    try:
        kind = jax.devices()[0].device_kind.lower()
    except Exception:
        kind = ""
    n_cores = 2 if "v7" in kind else 1
    g = max(1, min(B, n_cores))
    while B % g:
        g -= 1
    return g


def decoder_forward(packed, x, trim_output=True):
    """x: (B, L, hidden_dim) f32 -> (B, L, feat_num) f32.

    With trim_output=False the lane-dense (B, L, 128) padded slab is returned
    directly (extra columns are exactly zero), saving one extra HBM pass.
    """
    B, L, C = x.shape
    K = packed["kernel_size"]
    dilations = packed["dilations"]
    n_blocks = len(dilations)
    feat_num = packed["feat_num"]
    cout = packed["cout_pad"]

    G = _grid_steps_for_batch(B)
    Bt = B // G

    kernel, PAD = _make_decoder_kernel(Bt, L, C, K, dilations, cout)

    # Grid-invariant parameter specs.
    # TODO(synk): for large C on v7x (64 MiB VMEM) add
    # pipeline_mode=pl.Buffered(1) to these weight specs (double-buffering a
    # constant-index block is wasted VMEM); moot at these shapes.
    wspec = pl.BlockSpec((n_blocks, K * C, C), lambda i: (0, 0, 0))
    vspec = pl.BlockSpec((n_blocks, 1, C), lambda i: (0, 0, 0))

    out_padded = pl.pallas_call(
        kernel,
        out_shape=jax.ShapeDtypeStruct((B, L, cout), jnp.float32),
        grid=(G,),
        in_specs=[
            pl.BlockSpec((Bt, L, C), lambda i: (i, 0, 0)),        # x (batch tile)
            wspec, vspec, vspec, vspec,                           # conv1: W, b, gamma, beta
            wspec, vspec, vspec, vspec,                           # conv2: W, b, gamma, beta
            pl.BlockSpec((C, cout), lambda i: (0, 0)),            # fused tail W (bf16)
            pl.BlockSpec((1, cout), lambda i: (0, 0)),            # fused tail b (f32)
            pl.BlockSpec(memory_space=pltpu.MemorySpace.SMEM),    # residual scalars a
        ],
        out_specs=pl.BlockSpec((Bt, L, cout), lambda i: (i, 0, 0)),
        scratch_shapes=[pltpu.VMEM((Bt, PAD + L, C), jnp.float32)],  # causal-pad slab
        compiler_params=pltpu.CompilerParams(
            dimension_semantics=("parallel",),
            vmem_limit_bytes=64 * 1024 * 1024),
    )(x, packed["w1"], packed["b1"], packed["g1"], packed["bt1"],
      packed["w2"], packed["b2"], packed["g2"], packed["bt2"],
      packed["w_out"], packed["b_out"], packed["a"])

    if trim_output:
        return out_padded[..., :feat_num]
    return out_padded


if __name__ == "__main__":
    # Small shapes consistent with the module:
    #   hidden_dim = 32, feat_num = 4, block_num = 1, data_shape = (16, 4),
    #   dilations = [1, 4]  ->  TCN runs residual blocks with dilations 1 and 4.
    #   input x : (batch=2, seq_len=16, hidden_dim=32)
    feat_num, hidden_dim, block_num = 4, 32, 1
    data_shape = (16, 4)
    dilations = [1, 4]
    B, L = 2, data_shape[0]

    key = jax.random.PRNGKey(0)
    key, kx = jax.random.split(key)
    x = jax.random.normal(kx, (B, L, hidden_dim), jnp.float32)

    params = init_decoder_params(key, feat_num, hidden_dim, block_num, dilations)
    packed = pack_decoder_params(params)       # one-time stack / pad / fuse / bf16

    fwd = jax.jit(functools.partial(decoder_forward, packed))
    out = jax.block_until_ready(fwd(x))
    assert out.shape == (B, L, feat_num), out.shape
    assert bool(jnp.all(jnp.isfinite(out)))
    print("KERNEL_OK")
</pallas_src>

<mosaic_0001>
module attributes {stable_mosaic.version = 11 : i64} {
  func.func @kernel(%arg0: i32, %arg1: memref<2x16x32xf32, #tpu.memory_space<vmem>>, %arg2: memref<2x96x32xbf16, #tpu.memory_space<vmem>>, %arg3: memref<2x1x32xf32, #tpu.memory_space<vmem>>, %arg4: memref<2x1x32xf32, #tpu.memory_space<vmem>>, %arg5: memref<2x1x32xf32, #tpu.memory_space<vmem>>, %arg6: memref<2x96x32xbf16, #tpu.memory_space<vmem>>, %arg7: memref<2x1x32xf32, #tpu.memory_space<vmem>>, %arg8: memref<2x1x32xf32, #tpu.memory_space<vmem>>, %arg9: memref<2x1x32xf32, #tpu.memory_space<vmem>>, %arg10: memref<32x128xbf16, #tpu.memory_space<vmem>>, %arg11: memref<1x128xf32, #tpu.memory_space<vmem>>, %arg12: memref<2xf32, #tpu.memory_space<smem>>, %arg13: memref<2x16x128xf32, #tpu.memory_space<vmem>>, %arg14: memref<2x32x32xf32, #tpu.memory_space<vmem>>) attributes {dimension_semantics = [#tpu.dimension_semantics<parallel>], iteration_bounds = array<i64: 1>, scalar_prefetch = 0 : i64, scratch_operands = 1 : i64, tpu.core_type = #tpu.core_type<tc>, window_params = [{transform_indices = @transform_0, window_bounds = array<i64: 2, 16, 32>}, {pipeline_mode = #tpu.pipeline_mode<synchronous>, transform_indices = @transform_1, window_bounds = array<i64: 2, 96, 32>}, {pipeline_mode = #tpu.pipeline_mode<synchronous>, transform_indices = @transform_2, window_bounds = array<i64: 2, 1, 32>}, {pipeline_mode = #tpu.pipeline_mode<synchronous>, transform_indices = @transform_3, window_bounds = array<i64: 2, 1, 32>}, {pipeline_mode = #tpu.pipeline_mode<synchronous>, transform_indices = @transform_4, window_bounds = array<i64: 2, 1, 32>}, {pipeline_mode = #tpu.pipeline_mode<synchronous>, transform_indices = @transform_5, window_bounds = array<i64: 2, 96, 32>}, {pipeline_mode = #tpu.pipeline_mode<synchronous>, transform_indices = @transform_6, window_bounds = array<i64: 2, 1, 32>}, {pipeline_mode = #tpu.pipeline_mode<synchronous>, transform_indices = @transform_7, window_bounds = array<i64: 2, 1, 32>}, {pipeline_mode = #tpu.pipeline_mode<synchronous>, transform_indices = @transform_8, window_bounds = array<i64: 2, 1, 32>}, {pipeline_mode = #tpu.pipeline_mode<synchronous>, transform_indices = @transform_9, window_bounds = array<i64: 32, 128>}, {pipeline_mode = #tpu.pipeline_mode<synchronous>, transform_indices = @transform_10, window_bounds = array<i64: 1, 128>}, {transform_indices = @transform_11, window_bounds = array<i64: 2>}, {transform_indices = @transform_12, window_bounds = array<i64: 2, 16, 128>}]} {
    %cst = arith.constant 0.000000e+00 : f32
    %0 = vector.broadcast %cst : f32 to vector<2x16x32xf32>
    %c0 = arith.constant 0 : index
    %c0_0 = arith.constant 0 : index
    %c0_1 = arith.constant 0 : index
    %1 = vector.load %arg14[%c0, %c0_0, %c0_1] : memref<2x32x32xf32, #tpu.memory_space<vmem>>, vector<2x16x32xf32>
    tpu.vector_store %arg14[%c0, %c0_0, %c0_1], %0 {strides = array<i32>} : memref<2x32x32xf32, #tpu.memory_space<vmem>>, vector<2x16x32xf32>,
    %c0_2 = arith.constant 0 : index
    %c0_3 = arith.constant 0 : index
    %c0_4 = arith.constant 0 : index
    %2 = vector.load %arg1[%c0_2, %c0_3, %c0_4] : memref<2x16x32xf32, #tpu.memory_space<vmem>>, vector<2x16x32xf32>
    %3 = vector.shape_cast %2 : vector<2x16x32xf32> to vector<32x32xf32>
    %c0_5 = arith.constant 0 : index
    %c0_6 = arith.constant 0 : index
    %c0_7 = arith.constant 0 : index
    %4 = vector.load %arg3[%c0_5, %c0_6, %c0_7] : memref<2x1x32xf32, #tpu.memory_space<vmem>>, vector<1x1x32xf32>
    %5 = vector.shape_cast %4 : vector<1x1x32xf32> to vector<1x32xf32>
    %c0_8 = arith.constant 0 : index
    %c0_9 = arith.constant 0 : index
    %c0_10 = arith.constant 0 : index
    %6 = vector.load %arg4[%c0_8, %c0_9, %c0_10] : memref<2x1x32xf32, #tpu.memory_space<vmem>>, vector<1x1x32xf32>
    %7 = vector.shape_cast %6 : vector<1x1x32xf32> to vector<1x32xf32>
    %c0_11 = arith.constant 0 : index
    %c0_12 = arith.constant 0 : index
    %c0_13 = arith.constant 0 : index
    %8 = vector.load %arg5[%c0_11, %c0_12, %c0_13] : memref<2x1x32xf32, #tpu.memory_space<vmem>>, vector<1x1x32xf32>
    %9 = vector.shape_cast %8 : vector<1x1x32xf32> to vector<1x32xf32>
    %10 = vector.shape_cast %3 : vector<32x32xf32> to vector<2x16x32xf32>
    %c0_14 = arith.constant 0 : index
    %c16 = arith.constant 16 : index
    %c0_15 = arith.constant 0 : index
    %11 = vector.load %arg14[%c0_14, %c16, %c0_15] : memref<2x32x32xf32, #tpu.memory_space<vmem>>, vector<2x16x32xf32>
    tpu.vector_store %arg14[%c0_14, %c16, %c0_15], %10 {strides = array<i32>} : memref<2x32x32xf32, #tpu.memory_space<vmem>>, vector<2x16x32xf32>,
    %c0_16 = arith.constant 0 : index
    %c14 = arith.constant 14 : index
    %c0_17 = arith.constant 0 : index
    %12 = vector.load %arg14[%c0_16, %c14, %c0_17] : memref<2x32x32xf32, #tpu.memory_space<vmem>>, vector<2x16x32xf32>
    %c0_18 = arith.constant 0 : index
    %c15 = arith.constant 15 : index
    %c0_19 = arith.constant 0 : index
    %13 = vector.load %arg14[%c0_18, %c15, %c0_19] : memref<2x32x32xf32, #tpu.memory_space<vmem>>, vector<2x16x32xf32>
    %c0_20 = arith.constant 0 : index
    %c16_21 = arith.constant 16 : index
    %c0_22 = arith.constant 0 : index
    %14 = vector.load %arg14[%c0_20, %c16_21, %c0_22] : memref<2x32x32xf32, #tpu.memory_space<vmem>>, vector<2x16x32xf32>
    %15 = tpu.concatenate %12, %13, %14 in 2 : vector<2x16x32xf32>, vector<2x16x32xf32>, vector<2x16x32xf32> -> vector<2x16x96xf32>
    %16 = vector.shape_cast %15 : vector<2x16x96xf32> to vector<32x96xf32>
    %17 = arith.truncf %16 : vector<32x96xf32> to vector<32x96xbf16>
    %c0_23 = arith.constant 0 : index
    %c0_24 = arith.constant 0 : index
    %c0_25 = arith.constant 0 : index
    %18 = vector.load %arg2[%c0_23, %c0_24, %c0_25] : memref<2x96x32xbf16, #tpu.memory_space<vmem>>, vector<1x96x32xbf16>
    %19 = vector.shape_cast %18 : vector<1x96x32xbf16> to vector<96x32xbf16>
    %cst_26 = arith.constant dense<0.000000e+00> : vector<32x32xf32>
    %20 = tpu.matmul %17, %19, %cst_26 {dimension_numbers = #tpu.dot_dimension_numbers<[1], [0], [0], [1], [0, 0, 1, 1], [], []>} : vector<32x96xbf16>, vector<96x32xbf16>, vector<32x32xf32> -> vector<32x32xf32>
    %21 = vector.broadcast %5 : vector<1x32xf32> to vector<32x32xf32>
    %22 = arith.addf %20, %21 : vector<32x32xf32>
    %cst_27 = arith.constant dense<0.000000e+00> : vector<32xf32>
    %23 = vector.multi_reduction <add>, %22, %cst_27 [1] : vector<32x32xf32> to vector<32xf32>
    %24 = vector.shape_cast %23 : vector<32xf32> to vector<32x1xf32>
    %cst_28 = arith.constant 3.200000e+01 : f32
    %25 = vector.broadcast %cst_28 : f32 to vector<32x1xf32>
    %26 = arith.divf %24, %25 : vector<32x1xf32>
    %27 = arith.mulf %22, %22 : vector<32x32xf32>
    %cst_29 = arith.constant dense<0.000000e+00> : vector<32xf32>
    %28 = vector.multi_reduction <add>, %27, %cst_29 [1] : vector<32x32xf32> to vector<32xf32>
    %29 = vector.shape_cast %28 : vector<32xf32> to vector<32x1xf32>
    %cst_30 = arith.constant 3.200000e+01 : f32
    %30 = vector.broadcast %cst_30 : f32 to vector<32x1xf32>
    %31 = arith.divf %29, %30 : vector<32x1xf32>
    %32 = arith.mulf %26, %26 : vector<32x1xf32>
    %33 = arith.subf %31, %32 : vector<32x1xf32>
    %cst_31 = arith.constant 0.000000e+00 : f32
    %34 = vector.broadcast %cst_31 : f32 to vector<32x1xf32>
    %35 = arith.maximumf %33, %34 : vector<32x1xf32>
    %cst_32 = arith.constant 9.99999993E-9 : f32
    %36 = vector.broadcast %cst_32 : f32 to vector<32x1xf32>
    %37 = arith.addf %35, %36 : vector<32x1xf32>
    %38 = math.rsqrt %37 : vector<32x1xf32>
    %39 = vector.broadcast %7 : vector<1x32xf32> to vector<32x32xf32>
    %40 = vector.broadcast %38 : vector<32x1xf32> to vector<32x32xf32>
    %41 = arith.mulf %39, %40 : vector<32x32xf32>
    %42 = arith.mulf %22, %41 : vector<32x32xf32>
    %43 = vector.broadcast %26 : vector<32x1xf32> to vector<32x32xf32>
    %44 = arith.mulf %43, %41 : vector<32x32xf32>
    %45 = vector.broadcast %9 : vector<1x32xf32> to vector<32x32xf32>
    %46 = arith.subf %45, %44 : vector<32x32xf32>
    %47 = arith.addf %42, %46 : vector<32x32xf32>
    %cst_33 = arith.constant 0.000000e+00 : f32
    %48 = vector.broadcast %cst_33 : f32 to vector<32x32xf32>
    %49 = arith.maximumf %47, %48 : vector<32x32xf32>
    %c0_34 = arith.constant 0 : index
    %c0_35 = arith.constant 0 : index
    %c0_36 = arith.constant 0 : index
    %50 = vector.load %arg7[%c0_34, %c0_35, %c0_36] : memref<2x1x32xf32, #tpu.memory_space<vmem>>, vector<1x1x32xf32>
    %51 = vector.shape_cast %50 : vector<1x1x32xf32> to vector<1x32xf32>
    %c0_37 = arith.constant 0 : index
    %c0_38 = arith.constant 0 : index
    %c0_39 = arith.constant 0 : index
    %52 = vector.load %arg8[%c0_37, %c0_38, %c0_39] : memref<2x1x32xf32, #tpu.memory_space<vmem>>, vector<1x1x32xf32>
    %53 = vector.shape_cast %52 : vector<1x1x32xf32> to vector<1x32xf32>
    %c0_40 = arith.constant 0 : index
    %c0_41 = arith.constant 0 : index
    %c0_42 = arith.constant 0 : index
    %54 = vector.load %arg9[%c0_40, %c0_41, %c0_42] : memref<2x1x32xf32, #tpu.memory_space<vmem>>, vector<1x1x32xf32>
    %55 = vector.shape_cast %54 : vector<1x1x32xf32> to vector<1x32xf32>
    %56 = vector.shape_cast %49 : vector<32x32xf32> to vector<2x16x32xf32>
    %c0_43 = arith.constant 0 : index
    %c16_44 = arith.constant 16 : index
    %c0_45 = arith.constant 0 : index
    %57 = vector.load %arg14[%c0_43, %c16_44, %c0_45] : memref<2x32x32xf32, #tpu.memory_space<vmem>>, vector<2x16x32xf32>
    tpu.vector_store %arg14[%c0_43, %c16_44, %c0_45], %56 {strides = array<i32>} : memref<2x32x32xf32, #tpu.memory_space<vmem>>, vector<2x16x32xf32>,
    %c0_46 = arith.constant 0 : index
    %c12 = arith.constant 12 : index
    %c0_47 = arith.constant 0 : index
    %58 = vector.load %arg14[%c0_46, %c12, %c0_47] : memref<2x32x32xf32, #tpu.memory_space<vmem>>, vector<2x16x32xf32>
    %c0_48 = arith.constant 0 : index
    %c14_49 = arith.constant 14 : index
    %c0_50 = arith.constant 0 : index
    %59 = vector.load %arg14[%c0_48, %c14_49, %c0_50] : memref<2x32x32xf32, #tpu.memory_space<vmem>>, vector<2x16x32xf32>
    %c0_51 = arith.constant 0 : index
    %c16_52 = arith.constant 16 : index
    %c0_53 = arith.constant 0 : index
    %60 = vector.load %arg14[%c0_51, %c16_52, %c0_53] : memref<2x32x32xf32, #tpu.memory_space<vmem>>, vector<2x16x32xf32>
    %61 = tpu.concatenate %58, %59, %60 in 2 : vector<2x16x32xf32>, vector<2x16x32xf32>, vector<2x16x32xf32> -> vector<2x16x96xf32>
    %62 = vector.shape_cast %61 : vector<2x16x96xf32> to vector<32x96xf32>
    %63 = arith.truncf %62 : vector<32x96xf32> to vector<32x96xbf16>
    %c0_54 = arith.constant 0 : index
    %c0_55 = arith.constant 0 : index
    %c0_56 = arith.constant 0 : index
    %64 = vector.load %arg6[%c0_54, %c0_55, %c0_56] : memref<2x96x32xbf16, #tpu.memory_space<vmem>>, vector<1x96x32xbf16>
    %65 = vector.shape_cast %64 : vector<1x96x32xbf16> to vector<96x32xbf16>
    %cst_57 = arith.constant dense<0.000000e+00> : vector<32x32xf32>
    %66 = tpu.matmul %63, %65, %cst_57 {dimension_numbers = #tpu.dot_dimension_numbers<[1], [0], [0], [1], [0, 0, 1, 1], [], []>} : vector<32x96xbf16>, vector<96x32xbf16>, vector<32x32xf32> -> vector<32x32xf32>
    %67 = vector.broadcast %51 : vector<1x32xf32> to vector<32x32xf32>
    %68 = arith.addf %66, %67 : vector<32x32xf32>
    %cst_58 = arith.constant dense<0.000000e+00> : vector<32xf32>
    %69 = vector.multi_reduction <add>, %68, %cst_58 [1] : vector<32x32xf32> to vector<32xf32>
    %70 = vector.shape_cast %69 : vector<32xf32> to vector<32x1xf32>
    %cst_59 = arith.constant 3.200000e+01 : f32
    %71 = vector.broadcast %cst_59 : f32 to vector<32x1xf32>
    %72 = arith.divf %70, %71 : vector<32x1xf32>
    %73 = arith.mulf %68, %68 : vector<32x32xf32>
    %cst_60 = arith.constant dense<0.000000e+00> : vector<32xf32>
    %74 = vector.multi_reduction <add>, %73, %cst_60 [1] : vector<32x32xf32> to vector<32xf32>
    %75 = vector.shape_cast %74 : vector<32xf32> to vector<32x1xf32>
    %cst_61 = arith.constant 3.200000e+01 : f32
    %76 = vector.broadcast %cst_61 : f32 to vector<32x1xf32>
    %77 = arith.divf %75, %76 : vector<32x1xf32>
    %78 = arith.mulf %72, %72 : vector<32x1xf32>
    %79 = arith.subf %77, %78 : vector<32x1xf32>
    %cst_62 = arith.constant 0.000000e+00 : f32
    %80 = vector.broadcast %cst_62 : f32 to vector<32x1xf32>
    %81 = arith.maximumf %79, %80 : vector<32x1xf32>
    %cst_63 = arith.constant 9.99999993E-9 : f32
    %82 = vector.broadcast %cst_63 : f32 to vector<32x1xf32>
    %83 = arith.addf %81, %82 : vector<32x1xf32>
    %84 = math.rsqrt %83 : vector<32x1xf32>
    %85 = vector.broadcast %53 : vector<1x32xf32> to vector<32x32xf32>
    %86 = vector.broadcast %84 : vector<32x1xf32> to vector<32x32xf32>
    %87 = arith.mulf %85, %86 : vector<32x32xf32>
    %88 = arith.mulf %68, %87 : vector<32x32xf32>
    %89 = vector.broadcast %72 : vector<32x1xf32> to vector<32x32xf32>
    %90 = arith.mulf %89, %87 : vector<32x32xf32>
    %91 = vector.broadcast %55 : vector<1x32xf32> to vector<32x32xf32>
    %92 = arith.subf %91, %90 : vector<32x32xf32>
    %93 = arith.addf %88, %92 : vector<32x32xf32>
    %cst_64 = arith.constant 0.000000e+00 : f32
    %94 = vector.broadcast %cst_64 : f32 to vector<32x32xf32>
    %95 = arith.maximumf %93, %94 : vector<32x32xf32>
    %c0_65 = arith.constant 0 : index
    %96 = memref.load %arg12[%c0_65] : memref<2xf32, #tpu.memory_space<smem>>
    %97 = vector.broadcast %96 : f32 to vector<32x32xf32>
    %98 = arith.mulf %97, %95 : vector<32x32xf32>
    %99 = arith.addf %98, %3 : vector<32x32xf32>
    %c1 = arith.constant 1 : index
    %c0_66 = arith.constant 0 : index
    %c0_67 = arith.constant 0 : index
    %100 = vector.load %arg3[%c1, %c0_66, %c0_67] : memref<2x1x32xf32, #tpu.memory_space<vmem>>, vector<1x1x32xf32>
    %101 = vector.shape_cast %100 : vector<1x1x32xf32> to vector<1x32xf32>
    %c1_68 = arith.constant 1 : index
    %c0_69 = arith.constant 0 : index
    %c0_70 = arith.constant 0 : index
    %102 = vector.load %arg4[%c1_68, %c0_69, %c0_70] : memref<2x1x32xf32, #tpu.memory_space<vmem>>, vector<1x1x32xf32>
    %103 = vector.shape_cast %102 : vector<1x1x32xf32> to vector<1x32xf32>
    %c1_71 = arith.constant 1 : index
    %c0_72 = arith.constant 0 : index
    %c0_73 = arith.constant 0 : index
    %104 = vector.load %arg5[%c1_71, %c0_72, %c0_73] : memref<2x1x32xf32, #tpu.memory_space<vmem>>, vector<1x1x32xf32>
    %105 = vector.shape_cast %104 : vector<1x1x32xf32> to vector<1x32xf32>
    %106 = vector.shape_cast %99 : vector<32x32xf32> to vector<2x16x32xf32>
    %c0_74 = arith.constant 0 : index
    %c16_75 = arith.constant 16 : index
    %c0_76 = arith.constant 0 : index
    %107 = vector.load %arg14[%c0_74, %c16_75, %c0_76] : memref<2x32x32xf32, #tpu.memory_space<vmem>>, vector<2x16x32xf32>
    tpu.vector_store %arg14[%c0_74, %c16_75, %c0_76], %106 {strides = array<i32>} : memref<2x32x32xf32, #tpu.memory_space<vmem>>, vector<2x16x32xf32>,
    %c0_77 = arith.constant 0 : index
    %c8 = arith.constant 8 : index
    %c0_78 = arith.constant 0 : index
    %108 = vector.load %arg14[%c0_77, %c8, %c0_78] : memref<2x32x32xf32, #tpu.memory_space<vmem>>, vector<2x16x32xf32>
    %c0_79 = arith.constant 0 : index
    %c12_80 = arith.constant 12 : index
    %c0_81 = arith.constant 0 : index
    %109 = vector.load %arg14[%c0_79, %c12_80, %c0_81] : memref<2x32x32xf32, #tpu.memory_space<vmem>>, vector<2x16x32xf32>
    %c0_82 = arith.constant 0 : index
    %c16_83 = arith.constant 16 : index
    %c0_84 = arith.constant 0 : index
    %110 = vector.load %arg14[%c0_82, %c16_83, %c0_84] : memref<2x32x32xf32, #tpu.memory_space<vmem>>, vector<2x16x32xf32>
    %111 = tpu.concatenate %108, %109, %110 in 2 : vector<2x16x32xf32>, vector<2x16x32xf32>, vector<2x16x32xf32> -> vector<2x16x96xf32>
    %112 = vector.shape_cast %111 : vector<2x16x96xf32> to vector<32x96xf32>
    %113 = arith.truncf %112 : vector<32x96xf32> to vector<32x96xbf16>
    %c1_85 = arith.constant 1 : index
    %c0_86 = arith.constant 0 : index
    %c0_87 = arith.constant 0 : index
    %114 = vector.load %arg2[%c1_85, %c0_86, %c0_87] : memref<2x96x32xbf16, #tpu.memory_space<vmem>>, vector<1x96x32xbf16>
    %115 = vector.shape_cast %114 : vector<1x96x32xbf16> to vector<96x32xbf16>
    %cst_88 = arith.constant dense<0.000000e+00> : vector<32x32xf32>
    %116 = tpu.matmul %113, %115, %cst_88 {dimension_numbers = #tpu.dot_dimension_numbers<[1], [0], [0], [1], [0, 0, 1, 1], [], []>} : vector<32x96xbf16>, vector<96x32xbf16>, vector<32x32xf32> -> vector<32x32xf32>
    %117 = vector.broadcast %101 : vector<1x32xf32> to vector<32x32xf32>
    %118 = arith.addf %116, %117 : vector<32x32xf32>
    %cst_89 = arith.constant dense<0.000000e+00> : vector<32xf32>
    %119 = vector.multi_reduction <add>, %118, %cst_89 [1] : vector<32x32xf32> to vector<32xf32>
    %120 = vector.shape_cast %119 : vector<32xf32> to vector<32x1xf32>
    %cst_90 = arith.constant 3.200000e+01 : f32
    %121 = vector.broadcast %cst_90 : f32 to vector<32x1xf32>
    %122 = arith.divf %120, %121 : vector<32x1xf32>
    %123 = arith.mulf %118, %118 : vector<32x32xf32>
    %cst_91 = arith.constant dense<0.000000e+00> : vector<32xf32>
    %124 = vector.multi_reduction <add>, %123, %cst_91 [1] : vector<32x32xf32> to vector<32xf32>
    %125 = vector.shape_cast %124 : vector<32xf32> to vector<32x1xf32>
    %cst_92 = arith.constant 3.200000e+01 : f32
    %126 = vector.broadcast %cst_92 : f32 to vector<32x1xf32>
    %127 = arith.divf %125, %126 : vector<32x1xf32>
    %128 = arith.mulf %122, %122 : vector<32x1xf32>
    %129 = arith.subf %127, %128 : vector<32x1xf32>
    %cst_93 = arith.constant 0.000000e+00 : f32
    %130 = vector.broadcast %cst_93 : f32 to vector<32x1xf32>
    %131 = arith.maximumf %129, %130 : vector<32x1xf32>
    %cst_94 = arith.constant 9.99999993E-9 : f32
    %132 = vector.broadcast %cst_94 : f32 to vector<32x1xf32>
    %133 = arith.addf %131, %132 : vector<32x1xf32>
    %134 = math.rsqrt %133 : vector<32x1xf32>
    %135 = vector.broadcast %103 : vector<1x32xf32> to vector<32x32xf32>
    %136 = vector.broadcast %134 : vector<32x1xf32> to vector<32x32xf32>
    %137 = arith.mulf %135, %136 : vector<32x32xf32>
    %138 = arith.mulf %118, %137 : vector<32x32xf32>
    %139 = vector.broadcast %122 : vector<32x1xf32> to vector<32x32xf32>
    %140 = arith.mulf %139, %137 : vector<32x32xf32>
    %141 = vector.broadcast %105 : vector<1x32xf32> to vector<32x32xf32>
    %142 = arith.subf %141, %140 : vector<32x32xf32>
    %143 = arith.addf %138, %142 : vector<32x32xf32>
    %cst_95 = arith.constant 0.000000e+00 : f32
    %144 = vector.broadcast %cst_95 : f32 to vector<32x32xf32>
    %145 = arith.maximumf %143, %144 : vector<32x32xf32>
    %c1_96 = arith.constant 1 : index
    %c0_97 = arith.constant 0 : index
    %c0_98 = arith.constant 0 : index
    %146 = vector.load %arg7[%c1_96, %c0_97, %c0_98] : memref<2x1x32xf32, #tpu.memory_space<vmem>>, vector<1x1x32xf32>
    %147 = vector.shape_cast %146 : vector<1x1x32xf32> to vector<1x32xf32>
    %c1_99 = arith.constant 1 : index
    %c0_100 = arith.constant 0 : index
    %c0_101 = arith.constant 0 : index
    %148 = vector.load %arg8[%c1_99, %c0_100, %c0_101] : memref<2x1x32xf32, #tpu.memory_space<vmem>>, vector<1x1x32xf32>
    %149 = vector.shape_cast %148 : vector<1x1x32xf32> to vector<1x32xf32>
    %c1_102 = arith.constant 1 : index
    %c0_103 = arith.constant 0 : index
    %c0_104 = arith.constant 0 : index
    %150 = vector.load %arg9[%c1_102, %c0_103, %c0_104] : memref<2x1x32xf32, #tpu.memory_space<vmem>>, vector<1x1x32xf32>
    %151 = vector.shape_cast %150 : vector<1x1x32xf32> to vector<1x32xf32>
    %152 = vector.shape_cast %145 : vector<32x32xf32> to vector<2x16x32xf32>
    %c0_105 = arith.constant 0 : index
    %c16_106 = arith.constant 16 : index
    %c0_107 = arith.constant 0 : index
    %153 = vector.load %arg14[%c0_105, %c16_106, %c0_107] : memref<2x32x32xf32, #tpu.memory_space<vmem>>, vector<2x16x32xf32>
    tpu.vector_store %arg14[%c0_105, %c16_106, %c0_107], %152 {strides = array<i32>} : memref<2x32x32xf32, #tpu.memory_space<vmem>>, vector<2x16x32xf32>,
    %c0_108 = arith.constant 0 : index
    %c0_109 = arith.constant 0 : index
    %c0_110 = arith.constant 0 : index
    %154 = vector.load %arg14[%c0_108, %c0_109, %c0_110] : memref<2x32x32xf32, #tpu.memory_space<vmem>>, vector<2x16x32xf32>
    %c0_111 = arith.constant 0 : index
    %c8_112 = arith.constant 8 : index
    %c0_113 = arith.constant 0 : index
    %155 = vector.load %arg14[%c0_111, %c8_112, %c0_113] : memref<2x32x32xf32, #tpu.memory_space<vmem>>, vector<2x16x32xf32>
    %c0_114 = arith.constant 0 : index
    %c16_115 = arith.constant 16 : index
    %c0_116 = arith.constant 0 : index
    %156 = vector.load %arg14[%c0_114, %c16_115, %c0_116] : memref<2x32x32xf32, #tpu.memory_space<vmem>>, vector<2x16x32xf32>
    %157 = tpu.concatenate %154, %155, %156 in 2 : vector<2x16x32xf32>, vector<2x16x32xf32>, vector<2x16x32xf32> -> vector<2x16x96xf32>
    %158 = vector.shape_cast %157 : vector<2x16x96xf32> to vector<32x96xf32>
    %159 = arith.truncf %158 : vector<32x96xf32> to vector<32x96xbf16>
    %c1_117 = arith.constant 1 : index
    %c0_118 = arith.constant 0 : index
    %c0_119 = arith.constant 0 : index
    %160 = vector.load %arg6[%c1_117, %c0_118, %c0_119] : memref<2x96x32xbf16, #tpu.memory_space<vmem>>, vector<1x96x32xbf16>
    %161 = vector.shape_cast %160 : vector<1x96x32xbf16> to vector<96x32xbf16>
    %cst_120 = arith.constant dense<0.000000e+00> : vector<32x32xf32>
    %162 = tpu.matmul %159, %161, %cst_120 {dimension_numbers = #tpu.dot_dimension_numbers<[1], [0], [0], [1], [0, 0, 1, 1], [], []>} : vector<32x96xbf16>, vector<96x32xbf16>, vector<32x32xf32> -> vector<32x32xf32>
    %163 = vector.broadcast %147 : vector<1x32xf32> to vector<32x32xf32>
    %164 = arith.addf %162, %163 : vector<32x32xf32>
    %cst_121 = arith.constant dense<0.000000e+00> : vector<32xf32>
    %165 = vector.multi_reduction <add>, %164, %cst_121 [1] : vector<32x32xf32> to vector<32xf32>
    %166 = vector.shape_cast %165 : vector<32xf32> to vector<32x1xf32>
    %cst_122 = arith.constant 3.200000e+01 : f32
    %167 = vector.broadcast %cst_122 : f32 to vector<32x1xf32>
    %168 = arith.divf %166, %167 : vector<32x1xf32>
    %169 = arith.mulf %164, %164 : vector<32x32xf32>
    %cst_123 = arith.constant dense<0.000000e+00> : vector<32xf32>
    %170 = vector.multi_reduction <add>, %169, %cst_123 [1] : vector<32x32xf32> to vector<32xf32>
    %171 = vector.shape_cast %170 : vector<32xf32> to vector<32x1xf32>
    %cst_124 = arith.constant 3.200000e+01 : f32
    %172 = vector.broadcast %cst_124 : f32 to vector<32x1xf32>
    %173 = arith.divf %171, %172 : vector<32x1xf32>
    %174 = arith.mulf %168, %168 : vector<32x1xf32>
    %175 = arith.subf %173, %174 : vector<32x1xf32>
    %cst_125 = arith.constant 0.000000e+00 : f32
    %176 = vector.broadcast %cst_125 : f32 to vector<32x1xf32>
    %177 = arith.maximumf %175, %176 : vector<32x1xf32>
    %cst_126 = arith.constant 9.99999993E-9 : f32
    %178 = vector.broadcast %cst_126 : f32 to vector<32x1xf32>
    %179 = arith.addf %177, %178 : vector<32x1xf32>
    %180 = math.rsqrt %179 : vector<32x1xf32>
    %181 = vector.broadcast %149 : vector<1x32xf32> to vector<32x32xf32>
    %182 = vector.broadcast %180 : vector<32x1xf32> to vector<32x32xf32>
    %183 = arith.mulf %181, %182 : vector<32x32xf32>
    %184 = arith.mulf %164, %183 : vector<32x32xf32>
    %185 = vector.broadcast %168 : vector<32x1xf32> to vector<32x32xf32>
    %186 = arith.mulf %185, %183 : vector<32x32xf32>
    %187 = vector.broadcast %151 : vector<1x32xf32> to vector<32x32xf32>
    %188 = arith.subf %187, %186 : vector<32x32xf32>
    %189 = arith.addf %184, %188 : vector<32x32xf32>
    %cst_127 = arith.constant 0.000000e+00 : f32
    %190 = vector.broadcast %cst_127 : f32 to vector<32x32xf32>
    %191 = arith.maximumf %189, %190 : vector<32x32xf32>
    %c1_128 = arith.constant 1 : index
    %192 = memref.load %arg12[%c1_128] : memref<2xf32, #tpu.memory_space<smem>>
    %193 = vector.broadcast %192 : f32 to vector<32x32xf32>
    %194 = arith.mulf %193, %191 : vector<32x32xf32>
    %195 = arith.addf %194, %99 : vector<32x32xf32>
    %196 = arith.truncf %195 : vector<32x32xf32> to vector<32x32xbf16>
    %c0_129 = arith.constant 0 : index
    %c0_130 = arith.constant 0 : index
    %197 = vector.load %arg10[%c0_129, %c0_130] : memref<32x128xbf16, #tpu.memory_space<vmem>>, vector<32x128xbf16>
    %cst_131 = arith.constant dense<0.000000e+00> : vector<32x128xf32>
    %198 = tpu.matmul %196, %197, %cst_131 {dimension_numbers = #tpu.dot_dimension_numbers<[1], [0], [0], [1], [0, 0, 1, 1], [], []>} : vector<32x32xbf16>, vector<32x128xbf16>, vector<32x128xf32> -> vector<32x128xf32>
    %c0_132 = arith.constant 0 : index
    %c0_133 = arith.constant 0 : index
    %199 = vector.load %arg11[%c0_132, %c0_133] : memref<1x128xf32, #tpu.memory_space<vmem>>, vector<1x128xf32>
    %200 = vector.broadcast %199 : vector<1x128xf32> to vector<32x128xf32>
    %201 = arith.addf %198, %200 : vector<32x128xf32>
    %202 = vector.shape_cast %201 : vector<32x128xf32> to vector<2x16x128xf32>
    %c0_134 = arith.constant 0 : index
    %c0_135 = arith.constant 0 : index
    %c0_136 = arith.constant 0 : index
    %203 = vector.load %arg13[%c0_134, %c0_135, %c0_136] : memref<2x16x128xf32, #tpu.memory_space<vmem>>, vector<2x16x128xf32>
    tpu.vector_store %arg13[%c0_134, %c0_135, %c0_136], %202 {strides = array<i32>} : memref<2x16x128xf32, #tpu.memory_space<vmem>>, vector<2x16x128xf32>,
    return
  }
  func.func @transform_0(%arg0: i32) -> (i32, i32, i32) {
    %c0_i32 = arith.constant 0 : i32
    %c0_i32_0 = arith.constant 0 : i32
    %c0_i32_1 = arith.constant 0 : i32
    return %arg0, %c0_i32, %c0_i32_0 : i32, i32, i32
  }
  func.func @transform_1(%arg0: i32) -> (i32, i32, i32) {
    %c0_i32 = arith.constant 0 : i32
    %c0_i32_0 = arith.constant 0 : i32
    %c0_i32_1 = arith.constant 0 : i32
    %c0_i32_2 = arith.constant 0 : i32
    return %c0_i32, %c0_i32_0, %c0_i32_1 : i32, i32, i32
  }
  func.func @transform_2(%arg0: i32) -> (i32, i32, i32) {
    %c0_i32 = arith.constant 0 : i32
    %c0_i32_0 = arith.constant 0 : i32
    %c0_i32_1 = arith.constant 0 : i32
    %c0_i32_2 = arith.constant 0 : i32
    return %c0_i32, %c0_i32_0, %c0_i32_1 : i32, i32, i32
  }
  func.func @transform_3(%arg0: i32) -> (i32, i32, i32) {
    %c0_i32 = arith.constant 0 : i32
    %c0_i32_0 = arith.constant 0 : i32
    %c0_i32_1 = arith.constant 0 : i32
    %c0_i32_2 = arith.constant 0 : i32
    return %c0_i32, %c0_i32_0, %c0_i32_1 : i32, i32, i32
  }
  func.func @transform_4(%arg0: i32) -> (i32, i32, i32) {
    %c0_i32 = arith.constant 0 : i32
    %c0_i32_0 = arith.constant 0 : i32
    %c0_i32_1 = arith.constant 0 : i32
    %c0_i32_2 = arith.constant 0 : i32
    return %c0_i32, %c0_i32_0, %c0_i32_1 : i32, i32, i32
  }
  func.func @transform_5(%arg0: i32) -> (i32, i32, i32) {
    %c0_i32 = arith.constant 0 : i32
    %c0_i32_0 = arith.constant 0 : i32
    %c0_i32_1 = arith.constant 0 : i32
    %c0_i32_2 = arith.constant 0 : i32
    return %c0_i32, %c0_i32_0, %c0_i32_1 : i32, i32, i32
  }
  func.func @transform_6(%arg0: i32) -> (i32, i32, i32) {
    %c0_i32 = arith.constant 0 : i32
    %c0_i32_0 = arith.constant 0 : i32
    %c0_i32_1 = arith.constant 0 : i32
    %c0_i32_2 = arith.constant 0 : i32
    return %c0_i32, %c0_i32_0, %c0_i32_1 : i32, i32, i32
  }
  func.func @transform_7(%arg0: i32) -> (i32, i32, i32) {
    %c0_i32 = arith.constant 0 : i32
    %c0_i32_0 = arith.constant 0 : i32
    %c0_i32_1 = arith.constant 0 : i32
    %c0_i32_2 = arith.constant 0 : i32
    return %c0_i32, %c0_i32_0, %c0_i32_1 : i32, i32, i32
  }
  func.func @transform_8(%arg0: i32) -> (i32, i32, i32) {
    %c0_i32 = arith.constant 0 : i32
    %c0_i32_0 = arith.constant 0 : i32
    %c0_i32_1 = arith.constant 0 : i32
    %c0_i32_2 = arith.constant 0 : i32
    return %c0_i32, %c0_i32_0, %c0_i32_1 : i32, i32, i32
  }
  func.func @transform_9(%arg0: i32) -> (i32, i32) {
    %c0_i32 = arith.constant 0 : i32
    %c0_i32_0 = arith.constant 0 : i32
    %c0_i32_1 = arith.constant 0 : i32
    return %c0_i32, %c0_i32_0 : i32, i32
  }
  func.func @transform_10(%arg0: i32) -> (i32, i32) {
    %c0_i32 = arith.constant 0 : i32
    %c0_i32_0 = arith.constant 0 : i32
    %c0_i32_1 = arith.constant 0 : i32
    return %c0_i32, %c0_i32_0 : i32, i32
  }
  func.func @transform_11(%arg0: i32) -> i32 {
    %c0_i32 = arith.constant 0 : i32
    %c0_i32_0 = arith.constant 0 : i32
    return %c0_i32 : i32
  }
  func.func @transform_12(%arg0: i32) -> (i32, i32, i32) {
    %c0_i32 = arith.constant 0 : i32
    %c0_i32_0 = arith.constant 0 : i32
    %c0_i32_1 = arith.constant 0 : i32
    return %arg0, %c0_i32, %c0_i32_0 : i32, i32, i32
  }
}

</mosaic_0001>

<bundles_post_ra>
// kernel: decoder_forward.1
= control target key start
LH: loop header
LB: loop body
LE: loop exit
PB: predicated region body
PF: predicated region fallthrough
CT: control target
= control target key end

     0   :  { %17 = vsyncpa [#allocation4], 0  ;;  %s2532_s0 = inlined_call_operand.hbm [shape: f32[2,16,32], index: 0, kind: input, shape index: {}]   ;;  %s2533_s1 = inlined_call_operand.hbm [shape: bf16[2,96,32], index: 1, kind: input, shape index: {}]   ;;  %s2534_s2 = inlined_call_operand.hbm [shape: f32[2,1,32], index: 2, kind: input, shape index: {}, may-alias: {2,6}]   ;;  %s2535_s3 = inlined_call_operand.hbm [shape: f32[2,1,32], index: 3, kind: input, shape index: {}, may-alias: {3,7}]   ;;  %s2536_s4 = inlined_call_operand.hbm [shape: f32[2,1,32], index: 4, kind: input, shape index: {}, may-alias: {4,8}]   ;;  %s2537_s5 = inlined_call_operand.hbm [shape: bf16[2,96,32], index: 5, kind: input, shape index: {}]   ;;  %s2538_s6 = inlined_call_operand.hbm [shape: f32[2,1,32], index: 6, kind: input, shape index: {}, may-alias: {2,6}]   ;;  %s2539_s7 = inlined_call_operand.hbm [shape: f32[2,1,32], index: 7, kind: input, shape index: {}, may-alias: {3,7}]   ;;  %s2540_s8 = inlined_call_operand.hbm [shape: f32[2,1,32], index: 8, kind: input, shape index: {}, may-alias: {4,8}]   ;;  %s2541_s9 = inlined_call_operand.hbm [shape: bf16[32,128], index: 9, kind: input, shape index: {}]   ;;  %s2542_s10 = inlined_call_operand.hbm [shape: f32[1,128], index: 10, kind: input, shape index: {}]   ;;  %s2543_s11 = inlined_call_operand.hbm [shape: f32[2], index: 11, kind: input, shape index: {}]   ;;  %s2544_s12 = inlined_call_operand.hbm [shape: f32[2,16,128], index: 12, kind: output, shape index: {}]  }
   0x1   :  { %18 = vsyncpa [#allocation8], 0 }
   0x2   :  { %19 = vsyncpa [#allocation11], 0 }
   0x3   :  { %20 = vsyncpa [#allocation14], 0 }
   0x4   :  { %21 = vsyncpa [#allocation17], 0 }
   0x5   :  { %22 = vsyncpa [#allocation20], 0 }
   0x6   :  { %23 = vsyncpa [#allocation6], 0 }
   0x7   :  { %24 = vsyncpa [#allocation5], 0  ;;  %s1995_s21 = smov [#allocation7]   ;;  %s1705_s25 = scalar_lea.hbm %s2533_s1, 1536 }
   0x8   :  { %s42_s22 = sshll.u32 %s1995_s21, 4  ;;  %p1706_p0 = scmp.ne.s32.totalorder %s2533_s1, %s1705_s25  ;;  %s43_s22 = int_to_ptr.vmem [resolvable:$true] %s42_s22 }
   0x9   :  { %p1709_p1 = scmp.lt.u32.totalorder %s1705_s25, %s2533_s1 }
   0xb   :  { %p1711_p2 = pnand %p1709_p1, %p1706_p0 }
   0xd   :  { %1714 = shalt.err (!%p1711_p2)
}
   0xe   :  { %s1715_s30 = scalar_lea.vmem %s43_s22, 1536  ;;  %p1720_p4 = scmp.lt.s32.totalorder %s43_s22, %s43_s22 }
   0xf   :  { %p1716_p3 = scmp.ne.s32.totalorder %s43_s22, %s1715_s30  ;;  %p1721_p5 = scmp.lt.s32.totalorder %s1715_s30, %s1715_s30 }
  0x11   :  { %p1722_p6 = por %p1721_p5, %p1720_p4 }
  0x13   :  { %p1723_p7 = pnand %p1722_p6, %p1716_p3 }
  0x15   :  { %1726 = shalt.err (!%p1723_p7)
}
  0x16   :  { %s1996_s13 = smov 64   ;;  %s1997_s14 = smov 4  }
  0x17   :  { %48 = dma.hbm_to_vmem [thread:$0]  %s2533_s1, 1536, %s43_s22, [#allocation8], %s1996_s13, %s1996_s13, %s1997_s14  }
  0x18   :  { %s1998_s17 = smov [#allocation10]   ;;  %s1999_s19 = smov [#allocation13]  }
  0x19   :  { %s66_s18 = sshll.u32 %s1998_s17, 4  ;;  %s90_s20 = sshll.u32 %s1999_s19, 4  ;;  %s67_s18 = int_to_ptr.vmem [resolvable:$true] %s66_s18  ;;  %s91_s20 = int_to_ptr.vmem [resolvable:$true] %s90_s20 }
  0x1a   :  { %s1727_s24 = scalar_lea.hbm %s2535_s3, 32 }
  0x1b   :  { %p1728_p8 = scmp.ne.s32.totalorder %s2535_s3, %s1727_s24  ;;  %p1731_p9 = scmp.lt.u32.totalorder %s1727_s24, %s2535_s3 }
  0x1d   :  { %p1733_p10 = pnand %p1731_p9, %p1728_p8 }
  0x1f   :  { %1736 = shalt.err (!%p1733_p10)
}
  0x20   :  { %s1737_s1 = scalar_lea.vmem %s67_s18, 32  ;;  %p1742_p12 = scmp.lt.s32.totalorder %s67_s18, %s67_s18 }
  0x21   :  { %p1738_p11 = scmp.ne.s32.totalorder %s67_s18, %s1737_s1  ;;  %p1743_p13 = scmp.lt.s32.totalorder %s1737_s1, %s1737_s1 }
  0x23   :  { %p1744_p0 = por %p1743_p13, %p1742_p12 }
  0x25   :  { %p1745_p1 = pnand %p1744_p0, %p1738_p11 }
  0x27   :  { %1748 = shalt.err (!%p1745_p1)
}
  0x28   :  { %s2000_s22 = smov 16   ;;  %s2001_s29 = smov 1  }
  0x29   :  { %72 = dma.hbm_to_vmem [thread:$0]  %s2535_s3, 32, %s67_s18, [#allocation11], %s2000_s22, %s2000_s22, %s2001_s29  }
  0x2a   :  { %s1749_s19 = scalar_lea.hbm %s2537_s5, 1536 }
  0x2b   :  { %p1750_p2 = scmp.ne.s32.totalorder %s2537_s5, %s1749_s19  ;;  %p1753_p3 = scmp.lt.u32.totalorder %s1749_s19, %s2537_s5 }
  0x2d   :  { %p1755_p4 = pnand %p1753_p3, %p1750_p2 }
  0x2f   :  { %1758 = shalt.err (!%p1755_p4)
}
  0x30   :  { %s1759_s26 = scalar_lea.vmem %s91_s20, 1536  ;;  %p1764_p6 = scmp.lt.s32.totalorder %s91_s20, %s91_s20 }
  0x31   :  { %p1760_p5 = scmp.ne.s32.totalorder %s91_s20, %s1759_s26  ;;  %p1765_p7 = scmp.lt.s32.totalorder %s1759_s26, %s1759_s26 }
  0x33   :  { %p1766_p8 = por %p1765_p7, %p1764_p6 }
  0x35   :  { %p1767_p9 = pnand %p1766_p8, %p1760_p5 }
  0x37   :  { %1770 = shalt.err (!%p1767_p9)
}
  0x38   :  { %96 = dma.hbm_to_vmem [thread:$0]  %s2537_s5, 1536, %s91_s20, [#allocation14], %s1996_s13, %s1996_s13, %s1997_s14  }
  0x39   :  { %s2002_s27 = smov [#allocation16]   ;;  %s2003_s1 = smov [#allocation19]  }
  0x3a   :  { %s114_s28 = sshll.u32 %s2002_s27, 4  ;;  %s138_s30 = sshll.u32 %s2003_s1, 4  ;;  %s115_s28 = int_to_ptr.vmem [resolvable:$true] %s114_s28  ;;  %s139_s30 = int_to_ptr.vmem [resolvable:$true] %s138_s30 }
  0x3b   :  { %s1771_s17 = scalar_lea.hbm %s2539_s7, 32 }
  0x3c   :  { %p1772_p10 = scmp.ne.s32.totalorder %s2539_s7, %s1771_s17  ;;  %p1775_p11 = scmp.lt.u32.totalorder %s1771_s17, %s2539_s7 }
  0x3e   :  { %p1777_p12 = pnand %p1775_p11, %p1772_p10 }
  0x40   :  { %1780 = shalt.err (!%p1777_p12)
}
  0x41   :  { %s1781_s5 = scalar_lea.vmem %s115_s28, 32  ;;  %p1786_p0 = scmp.lt.s32.totalorder %s115_s28, %s115_s28 }
  0x42   :  { %p1782_p13 = scmp.ne.s32.totalorder %s115_s28, %s1781_s5  ;;  %p1787_p1 = scmp.lt.s32.totalorder %s1781_s5, %s1781_s5 }
  0x44   :  { %p1788_p2 = por %p1787_p1, %p1786_p0 }
  0x46   :  { %p1789_p3 = pnand %p1788_p2, %p1782_p13 }
  0x48   :  { %1792 = shalt.err (!%p1789_p3)
}
  0x49   :  { %120 = dma.hbm_to_vmem [thread:$0]  %s2539_s7, 32, %s115_s28, [#allocation17], %s2000_s22, %s2000_s22, %s2001_s29  }
  0x4a   :  { %s1793_s18 = scalar_lea.hbm %s2541_s9, 256 }
  0x4b   :  { %p1794_p4 = scmp.ne.s32.totalorder %s2541_s9, %s1793_s18  ;;  %p1797_p5 = scmp.lt.u32.totalorder %s1793_s18, %s2541_s9 }
  0x4d   :  { %p1799_p6 = pnand %p1797_p5, %p1794_p4 }
  0x4f   :  { %1802 = shalt.err (!%p1799_p6)
}
  0x50   :  { %s1803_s17 = scalar_lea.vmem %s139_s30, 256  ;;  %p1808_p8 = scmp.lt.s32.totalorder %s139_s30, %s139_s30 }
  0x51   :  { %p1804_p7 = scmp.ne.s32.totalorder %s139_s30, %s1803_s17  ;;  %p1809_p9 = scmp.lt.s32.totalorder %s1803_s17, %s1803_s17 }
  0x53   :  { %p1810_p10 = por %p1809_p9, %p1808_p8 }
  0x55   :  { %p1811_p11 = pnand %p1810_p10, %p1804_p7 }
  0x57   :  { %1814 = shalt.err (!%p1811_p11)
}
  0x58   :  { %144 = dma.hbm_to_vmem [thread:$0]  %s2541_s9, 256, %s139_s30, [#allocation20], %s1996_s13, %s1996_s13, %s1997_s14  }
  0x59   :  { %s2004_s19 = smov [#allocation3]   ;;  %s1815_s5 = scalar_lea.hbm %s2532_s0, 512 }
  0x5a   :  { %s30_s21 = sshll.u32 %s2004_s19, 4  ;;  %p1816_p12 = scmp.ne.s32.totalorder %s2532_s0, %s1815_s5  ;;  %s31_s21 = int_to_ptr.vmem [resolvable:$true] %s30_s21 }
  0x5b   :  { %p1819_p13 = scmp.lt.u32.totalorder %s1815_s5, %s2532_s0 }
  0x5d   :  { %p1821_p0 = pnand %p1819_p13, %p1816_p12 }
  0x5f   :  { %1824 = shalt.err (!%p1821_p0)
}
  0x60   :  { %s1825_s18 = scalar_lea.vmem %s31_s21, 512  ;;  %p1830_p2 = scmp.lt.s32.totalorder %s31_s21, %s31_s21 }
  0x61   :  { %p1826_p1 = scmp.ne.s32.totalorder %s31_s21, %s1825_s18  ;;  %p1831_p3 = scmp.lt.s32.totalorder %s1825_s18, %s1825_s18 }
  0x63   :  { %p1832_p4 = por %p1831_p3, %p1830_p2 }
  0x65   :  { %p1833_p5 = pnand %p1832_p4, %p1826_p1 }
  0x67   :  { %1836 = shalt.err (!%p1833_p5)
}
  0x68   :  { %s2005_s9 = smov 128   ;;  %s2006_s14 = smov 8  }
  0x69   :  { %36 = dma.hbm_to_vmem [thread:$0]  %s2532_s0, 512, %s31_s21, [#allocation4], %s2005_s9, %s2005_s9, %s2006_s14  }
  0x6a   :  { %s2007_s1 = smov [#allocation9]   ;;  %s2008_s16 = smov [#allocation12]  }
  0x6b   :  { %s54_s15 = sshll.u32 %s2007_s1, 4  ;;  %s78_s17 = sshll.u32 %s2008_s16, 4  ;;  %s55_s15 = int_to_ptr.vmem [resolvable:$true] %s54_s15  ;;  %s2171_s17 = int_to_ptr.vmem [resolvable:$true] %s78_s17 }
  0x6c   :  { %s1837_s19 = scalar_lea.hbm %s2534_s2, 32 }
  0x6d   :  { %p1838_p6 = scmp.ne.s32.totalorder %s2534_s2, %s1837_s19  ;;  %p1841_p7 = scmp.lt.u32.totalorder %s1837_s19, %s2534_s2 }
  0x6f   :  { %p1843_p8 = pnand %p1841_p7, %p1838_p6 }
  0x71   :  { %1846 = shalt.err (!%p1843_p8)
}
  0x72   :  { %s1847_s0 = scalar_lea.vmem %s55_s15, 32  ;;  %p1852_p10 = scmp.lt.s32.totalorder %s55_s15, %s55_s15 }
  0x73   :  { %p1848_p9 = scmp.ne.s32.totalorder %s55_s15, %s1847_s0  ;;  %p1853_p11 = scmp.lt.s32.totalorder %s1847_s0, %s1847_s0 }
  0x75   :  { %p1854_p12 = por %p1853_p11, %p1852_p10 }
  0x77   :  { %p1855_p13 = pnand %p1854_p12, %p1848_p9 }
  0x79   :  { %1858 = shalt.err (!%p1855_p13)
}
  0x7a   :  { %60 = dma.hbm_to_vmem [thread:$0]  %s2534_s2, 32, %s55_s15, [#allocation8], %s2000_s22, %s2000_s22, %s2001_s29  }
  0x7b   :  { %s1859_s18 = scalar_lea.hbm %s2536_s4, 32 }
  0x7c   :  { %p1860_p0 = scmp.ne.s32.totalorder %s2536_s4, %s1859_s18  ;;  %p1863_p1 = scmp.lt.u32.totalorder %s1859_s18, %s2536_s4 }
  0x7e   :  { %p1865_p2 = pnand %p1863_p1, %p1860_p0 }
  0x80   :  { %1868 = shalt.err (!%p1865_p2)
}
  0x81   :  { %s1869_s7 = scalar_lea.vmem %s2171_s17, 32  ;;  %p1874_p4 = scmp.lt.s32.totalorder %s2171_s17, %s2171_s17 }
  0x82   :  { %p1870_p3 = scmp.ne.s32.totalorder %s2171_s17, %s1869_s7  ;;  %p1875_p5 = scmp.lt.s32.totalorder %s1869_s7, %s1869_s7 }
  0x84   :  { %p1876_p6 = por %p1875_p5, %p1874_p4 }
  0x86   :  { %p1877_p7 = pnand %p1876_p6, %p1870_p3 }
  0x88   :  { %1880 = shalt.err (!%p1877_p7)
}
  0x89   :  { %84 = dma.hbm_to_vmem [thread:$0]  %s2536_s4, 32, %s2171_s17, [#allocation11], %s2000_s22, %s2000_s22, %s2001_s29  }
  0x8a   :  { %s2009_s28 = smov [#allocation15]   ;;  %s2010_s23 = smov [#allocation18]  }
  0x8b   :  { %s102_s19 = sshll.u32 %s2009_s28, 4  ;;  %s126_s24 = sshll.u32 %s2010_s23, 4  ;;  %s103_s19 = int_to_ptr.vmem [resolvable:$true] %s102_s19  ;;  %s2208_s24 = int_to_ptr.vmem [resolvable:$true] %s126_s24 }
  0x8c   :  { %s1881_s0 = scalar_lea.hbm %s2538_s6, 32 }
  0x8d   :  { %p1882_p8 = scmp.ne.s32.totalorder %s2538_s6, %s1881_s0  ;;  %p1885_p9 = scmp.lt.u32.totalorder %s1881_s0, %s2538_s6 }
  0x8f   :  { %p1887_p10 = pnand %p1885_p9, %p1882_p8 }
  0x91   :  { %1890 = shalt.err (!%p1887_p10)
}
  0x92   :  { %s1891_s4 = scalar_lea.vmem %s103_s19, 32  ;;  %p1896_p12 = scmp.lt.s32.totalorder %s103_s19, %s103_s19 }
  0x93   :  { %p1892_p11 = scmp.ne.s32.totalorder %s103_s19, %s1891_s4  ;;  %p1897_p13 = scmp.lt.s32.totalorder %s1891_s4, %s1891_s4 }
  0x95   :  { %p1898_p0 = por %p1897_p13, %p1896_p12 }
  0x97   :  { %p1899_p1 = pnand %p1898_p0, %p1892_p11 }
  0x99   :  { %1902 = shalt.err (!%p1899_p1)
}
  0x9a   :  { %108 = dma.hbm_to_vmem [thread:$0]  %s2538_s6, 32, %s103_s19, [#allocation14], %s2000_s22, %s2000_s22, %s2001_s29  }
  0x9b   :  { %s1903_s1 = scalar_lea.hbm %s2540_s8, 32 }
  0x9c   :  { %p1904_p2 = scmp.ne.s32.totalorder %s2540_s8, %s1903_s1  ;;  %p1907_p3 = scmp.lt.u32.totalorder %s1903_s1, %s2540_s8 }
  0x9e   :  { %p1909_p4 = pnand %p1907_p3, %p1904_p2 }
  0xa0   :  { %1912 = shalt.err (!%p1909_p4)
}
  0xa1   :  { %s1913_s28 = scalar_lea.vmem %s2208_s24, 32  ;;  %p1918_p6 = scmp.lt.s32.totalorder %s2208_s24, %s2208_s24 }
  0xa2   :  { %p1914_p5 = scmp.ne.s32.totalorder %s2208_s24, %s1913_s28  ;;  %p1919_p7 = scmp.lt.s32.totalorder %s1913_s28, %s1913_s28 }
  0xa4   :  { %p1920_p8 = por %p1919_p7, %p1918_p6 }
  0xa6   :  { %p1921_p9 = pnand %p1920_p8, %p1914_p5 }
  0xa8   :  { %1924 = shalt.err (!%p1921_p9)
}
  0xa9   :  { %132 = dma.hbm_to_vmem [thread:$0]  %s2540_s8, 32, %s2208_s24, [#allocation17], %s2000_s22, %s2000_s22, %s2001_s29  }
  0xaa   :  { %s2011_s23 = smov [#allocation21]   ;;  %s1925_s21 = scalar_lea.hbm %s2542_s10, 16 }
  0xab   :  { %s151_s5 = sshll.u32 %s2011_s23, 4  ;;  %p1926_p10 = scmp.ne.s32.totalorder %s2542_s10, %s1925_s21  ;;  %s152_s5 = int_to_ptr.vmem [resolvable:$true] %s151_s5 }
  0xac   :  { %p1929_p11 = scmp.lt.u32.totalorder %s1925_s21, %s2542_s10 }
  0xae   :  { %p1931_p12 = pnand %p1929_p11, %p1926_p10 }
  0xb0   :  { %1934 = shalt.err (!%p1931_p12)
}
  0xb1   :  { %s1935_s17 = scalar_lea.vmem %s152_s5, 16  ;;  %s1939_s8 = scalar_lea.vmem %s152_s5, 32 }
  0xb2   :  { %p1936_p13 = scmp.ne.s32.totalorder %s152_s5, %s1935_s17  ;;  %p1940_p0 = scmp.lt.s32.totalorder %s152_s5, %s152_s5 }
  0xb3   :  { %p1941_p1 = scmp.lt.s32.totalorder %s1939_s8, %s1935_s17 }
  0xb5   :  { %p1942_p2 = por %p1941_p1, %p1940_p0 }
  0xb7   :  { %p1943_p3 = pnand %p1942_p2, %p1936_p13 }
  0xb9   :  { %1946 = shalt.err (!%p1943_p3)
}
  0xba   :  { %154 = dma.hbm_to_vmem [thread:$0]  %s2542_s10, 16, %s152_s5, [#allocation20]  }
  0xbb   :  { %s1947_s30 = scalar_lea.hbm %s2543_s11, 16 }
  0xbc   :  { %p1948_p4 = scmp.ne.s32.totalorder %s2543_s11, %s1947_s30  ;;  %p1951_p5 = scmp.lt.u32.totalorder %s1947_s30, %s2543_s11 }
  0xbe   :  { %p1953_p6 = pnand %p1951_p5, %p1948_p4 }
  0xc0   :  { %1956 = shalt.err (!%p1953_p6)
}
  0xc1   :  { %s2012_s2 = smov [#allocation22]  }
  0xc2   :  { %162 = dma.hbm_to_smem %s2543_s11, 16, %s2012_s2, [#allocation6]  }
  0xc3   :  { %1979 = dma.done.wait [#allocation4], 512  }
  0xc4   :  { %1980 = vsyncadd [#allocation4], 4294966784 }
  0xc5   :  { %1981 = dma.done.wait [#allocation8], 1568  }
  0xc6   :  { %1982 = vsyncadd [#allocation8], 4294965728 }
  0xc7   :  { %1983 = dma.done.wait [#allocation11], 64  }
  0xc8   :  { %1984 = vsyncadd [#allocation11], 4294967232 }
  0xc9   :  { %1985 = dma.done.wait [#allocation14], 1568  }
  0xca   :  { %1986 = vsyncadd [#allocation14], 4294965728 }
  0xcb   :  { %1987 = dma.done.wait [#allocation17], 64  }
  0xcc   :  { %1988 = vsyncadd [#allocation17], 4294967232 }
  0xcd   :  { %1989 = dma.done.wait [#allocation20], 272  }
  0xce   :  { %1990 = vsyncadd [#allocation20], 4294967024 }
  0xcf   :  { %1991 = dma.done.wait [#allocation6], 16  }
  0xd0   :  { %1992 = vsyncadd [#allocation6], 4294967280 }
  0xd1   :  { %199 = sfence }
  0xd2   :  { %vm201_vm0 = vcmask 261120   ;;  %v2269_v0 = vld [vmem:[#allocation3] sm:$0xff]  ;;  %v2271_v1 = vld [vmem:[#allocation3 + $0x8] sm:$0xff]  ;;  %v2273_v2 = vld [vmem:[#allocation3 + $0x10] sm:$0xff]  ;;  %v2013_v3 = vmov 0.0   ;;  %s2014_s10 = smov 32  }
  0xd3   :  { %203 = vst.msk [vmem:[#allocation2 + $0x8] sm:$0xff] %vm201_vm0, %v2013_v3  ;;  %213 = vst.msk [vmem:[#allocation2 + $0x10] sm:$0xff] %vm201_vm0, %v2269_v0  ;;  %v2283_v4 = vld [vmem:[#allocation3 + $0x18] sm:$0xff]  ;;  %v1647_v5 = vld [vmem:[#allocation7] sm:$0xff]   ;;  %vm265_vm1 = vcmask 523264   ;;  %vm326_vm2 = vcmask 785408  }
  0xd4   :  { %214 = vst.msk [vmem:[#allocation2 + $0x18] sm:$0xff] %vm201_vm0, %v2271_v1  ;;  %202 = vst.msk [vmem:[#allocation2] sm:$0xff] %vm201_vm0, %v2013_v3  ;;  %v1648_v6 = vld [vmem:[#allocation7 + $0x8] sm:$0xff]   ;;  %1474 = vmatprep.subr.bf16.mxu0 %v1647_v5  ;;  %v1649_v7 = vld [vmem:[#allocation7 + $0x10] sm:$0xff]   ;;  %s737_s11 = sld [smem:[#allocation22]]  ;;  %s2015_s6 = smov [#allocation23]  }
  0xd5   :  { %204 = vst.msk [vmem:[#allocation2 + $0x20] sm:$0xff] %vm201_vm0, %v2013_v3  ;;  %205 = vst.msk [vmem:[#allocation2 + $0x28] sm:$0xff] %vm201_vm0, %v2013_v3  ;;  %1475 = vmatpush3.bf16.msra.mxu0 %v1647_v5  ;;  %v1650_v18 = vld [vmem:[#allocation7 + $0x18] sm:$0xff]   ;;  %v1651_v21 = vld [vmem:[#allocation7 + $0x20] sm:$0xff]   ;;  %s1370_s19 = sshll.u32 %s2015_s6, 4  ;;  %s1371_s19 = int_to_ptr.vmem [resolvable:$true] %s1370_s19 }
  0xd6   :  { %215 = vst.msk [vmem:[#allocation2 + $0x30] sm:$0xff] %vm201_vm0, %v2273_v2  ;;  %216 = vst.msk [vmem:[#allocation2 + $0x38] sm:$0xff] %vm201_vm0, %v2283_v4  ;;  %1476 = vmatprep.subr.bf16.mxu0 %v1648_v6  ;;  %v1652_v22 = vld [vmem:[#allocation7 + $0x28] sm:$0xff]   ;;  %v1388_v49 = vld [vmem:[#allocation9] ss:$0 sm:$0xff]  ;;  %s1957_s23 = scalar_lea.vmem %s1371_s19, 512  ;;  %p1962_p8 = scmp.lt.s32.totalorder %s1371_s19, %s1371_s19 }
  0xd7   :  { %p1958_p7 = scmp.ne.s32.totalorder %s1371_s19, %s1957_s23  ;;  %p1963_p9 = scmp.lt.s32.totalorder %s1957_s23, %s1957_s23 }
  0xd9   :  { %1477 = vmatpush3.bf16.msra.mxu0 %v1648_v6  ;;  %p1964_p10 = por %p1963_p9, %p1962_p8 }
  0xda   :  { %v221_v8 = vld [vmem:[#allocation2 + $0xf] sm:$0xff]  ;;  %1478 = vmatprep.subr.bf16.mxu0 %v1649_v7 }
  0xdb   :  { %v222_v9 = vld [vmem:[#allocation2 + $0x17] sm:$0xff]  ;;  %v217_v24 = vld [vmem:[#allocation2 + $0xe] sm:$0xff]  ;;  %p1965_p11 = pnand %p1964_p10, %p1958_p7 }
  0xdc   :  { %v225_v10 = vld [vmem:[#allocation2 + $0x10] sm:$0xff]  ;;  %v1567_v11 = vpack.i.bf16 %v222_v9, %v221_v8  ;;  %v226_v12 = vld [vmem:[#allocation2 + $0x18] sm:$0xff] }
  0xdd   :  { %v223_v13 = vld [vmem:[#allocation2 + $0x2f] sm:$0xff]  ;;  %v224_v14 = vld [vmem:[#allocation2 + $0x37] sm:$0xff]  ;;  %v1577_v15 = vpack.i.bf16 %v226_v12, %v225_v10  ;;  %1479 = vmatpush3.bf16.msra.mxu0 %v1649_v7  ;;  %v1653_v10 = vld [vmem:[#allocation13] sm:$0xff]  }
  0xde   :  { %v227_v16 = vld [vmem:[#allocation2 + $0x30] sm:$0xff]  ;;  %v228_v17 = vld [vmem:[#allocation2 + $0x38] sm:$0xff]  ;;  %1568 = vrot.lane.b32.xlu0 %v1567_v11, %s2014_s10  ;;  %v1572_v19 = vpack.i.bf16 %v224_v14, %v223_v13  ;;  %1480 = vmatprep.subr.bf16.mxu0 %v1650_v18 }
  0xdf   :  { %1578 = vrot.lane.b32.xlu1 %v1577_v15, %s1996_s13  ;;  %v1582_v20 = vpack.i.bf16 %v228_v17, %v227_v16  ;;  %v218_v25 = vld [vmem:[#allocation2 + $0x16] sm:$0xff]  ;;  %v219_v33 = vld [vmem:[#allocation2 + $0x2e] sm:$0xff]  ;;  %1490 = vmatprep.subr.bf16.mxu1 %v1653_v10 }
  0xe0   :  { %v220_v34 = vld [vmem:[#allocation2 + $0x36] sm:$0xff]  ;;  %v1654_v11 = vld [vmem:[#allocation13 + $0x8] sm:$0xff]   ;;  %1491 = vmatpush3.bf16.msra.mxu1 %v1653_v10 }
  0xe1   :  { %1481 = vmatpush3.bf16.msra.mxu0 %v1650_v18  ;;  %1492 = vmatprep.subr.bf16.mxu1 %v1654_v11  ;;  %v1655_v12 = vld [vmem:[#allocation13 + $0x10] sm:$0xff]  }
  0xe2   :  { %1573 = vrot.lane.b32.xlu0 %v1572_v19, %s2014_s10  ;;  %1482 = vmatprep.subr.bf16.mxu0 %v1651_v21 }
  0xe3   :  { %1583 = vrot.lane.b32.xlu1 %v1582_v20, %s1996_s13 }
  0xe4   :  { %1493 = vmatpush3.bf16.msra.mxu1 %v1654_v11 }
  0xe5   :  { %1483 = vmatpush3.bf16.msra.mxu0 %v1651_v21  ;;  %1494 = vmatprep.subr.bf16.mxu1 %v1655_v12 }
  0xe6   :  { %1484 = vmatprep.subr.bf16.mxu0 %v1652_v22 }
  0xe8   :  { %1495 = vmatpush3.bf16.msra.mxu1 %v1655_v12  ;;  %v1656_v12 = vld [vmem:[#allocation13 + $0x18] sm:$0xff]  }
  0xe9   :  { %1485 = vmatpush3.bf16.msra.mxu0 %v1652_v22  ;;  %1496 = vmatprep.subr.bf16.mxu1 %v1656_v12 }
  0xec   :  { %1497 = vmatpush3.bf16.msra.mxu1 %v1656_v12 }
 0x150   :  { %v1569_v23 = vpop.permute.xlu0 %1568 }
 0x151   :  { %v1571_v26 = vunpack.i.h.bf16 %v1569_v23  ;;  %v1570_v27 = vunpack.i.l.bf16 %v1569_v23  ;;  %v1579_v28 = vpop.permute.xlu1 %1578 }
 0x152   :  { %v1581_v29 = vunpack.i.h.bf16 %v1579_v28  ;;  %v1580_v30 = vunpack.i.l.bf16 %v1579_v28 }
 0x153   :  { %v261_v31 = vsel %vm201_vm0, %v217_v24, %v1570_v27  ;;  %v262_v32 = vsel %vm201_vm0, %v218_v25, %v1571_v26 }
 0x154   :  { %v1574_v35 = vpop.permute.xlu0 %1573  ;;  %v266_v36 = vsel %vm265_vm1, %v261_v31, %v1580_v30  ;;  %v267_v37 = vsel %vm265_vm1, %v262_v32, %v1581_v29 }
 0x155   :  { %v1576_v38 = vunpack.i.h.bf16 %v1574_v35  ;;  %v1575_v39 = vunpack.i.l.bf16 %v1574_v35  ;;  %v1584_v40 = vpop.permute.xlu1 %1583  ;;  %v270_v41 = vpack.c.bf16 %v267_v37, %v266_v36 }
 0x156   :  { %v1586_v42 = vunpack.i.h.bf16 %v1584_v40  ;;  %v1585_v43 = vunpack.i.l.bf16 %v1584_v40 }
 0x157   :  { %v264_v44 = vsel %vm201_vm0, %v220_v34, %v1576_v38  ;;  %v263_v45 = vsel %vm201_vm0, %v219_v33, %v1575_v39  ;;  %1486 = vmatprep.mubr.msk.bf16.mxu0 %vm326_vm2, %v270_v41 }
 0x158   :  { %v268_v46 = vsel %vm265_vm1, %v263_v45, %v1585_v43  ;;  %v269_v47 = vsel %vm265_vm1, %v264_v44, %v1586_v42  ;;  %v1397_v45 = vld [vmem:[#allocation10] ss:$0 sm:$0xff] }
 0x159   :  { %v271_v48 = vpack.c.bf16 %v269_v47, %v268_v46 }
 0x15b   :  { %1487 = vmatmul.mubr.msk.bf16.vlgmr.msra.gmra.mrb[0].mxu0 %vm326_vm2, %v271_v48  ;;  %v1398_v48 = vld [vmem:[#allocation12] ss:$0 sm:$0xff] }
 0x22e   :  { %v1488_v50 = vpop.f32.mrb[0].mxu0 }
 0x22f   :  { %v2303_v51 = vadd.f32 %v1488_v50, %v1388_v49  ;;  %v367_v52 = vpop.f32.mrb[1].mxu0 }
 0x230   :  { %v2305_v53 = vadd.f32 %v1388_v49, %v367_v52  ;;  %v1489_v54 = vpop.f32.mrb[2].mxu0 }
 0x231   :  { %v370_v55 = vpop.f32.mrb[3].mxu0  ;;  %v388_v56 = vsel %vm201_vm0, %v2303_v51, 0.0  ;;  %v2315_v60 = vadd.f32 %v1489_v54, %v1388_v49  ;;  %v401_v63 = vmul.f32 %v2303_v51, %v2303_v51 }
 0x232   :  { %v2309_v57 = vadd.f32 %v1388_v49, %v370_v55  ;;  %389 = vadd.xlane.f32.xlu0 %v388_v56  ;;  %v399_v59 = vmul.f32 %v2305_v53, %v2305_v53  ;;  %v382_v61 = vsel %vm201_vm0, %v2305_v53, 0.0 }
 0x233   :  { %v391_v3 = vsel %vm201_vm0, %v2315_v60, 0.0  ;;  %v409_v6 = vsel %vm201_vm0, %v401_v63, 0.0  ;;  %v402_v8 = vmul.f32 %v2315_v60, %v2315_v60 }
 0x234   :  { %v385_v58 = vsel %vm201_vm0, %v2309_v57, 0.0  ;;  %v403_v62 = vsel %vm201_vm0, %v399_v59, 0.0  ;;  %v400_v5 = vmul.f32 %v2309_v57, %v2309_v57 }
 0x235   :  { %386 = vadd.xlane.f32.xlu1 %v385_v58  ;;  %v412_v9 = vsel %vm201_vm0, %v402_v8, 0.0 }
 0x236   :  { %383 = vadd.xlane.f32.xlu0 %v382_v61  ;;  %v406_v7 = vsel %vm201_vm0, %v400_v5, 0.0 }
 0x239   :  { %404 = vadd.xlane.f32.xlu1 %v403_v62 }
 0x23a   :  { %392 = vadd.xlane.f32.xlu0 %v391_v3 }
 0x23d   :  { %410 = vadd.xlane.f32.xlu1 %v409_v6 }
 0x23e   :  { %407 = vadd.xlane.f32.xlu0 %v406_v7 }
 0x242   :  { %413 = vadd.xlane.f32.xlu0 %v412_v9 }
 0x2bf   :  { %v390_v13 = vpop.xlane.xlu0 %389 }
 0x2c0   :  { %v397_v19 = vmul.f32 0.03125, %v390_v13 }
 0x2c2   :  { %v387_v14 = vpop.xlane.xlu1 %386  ;;  %v421_v25 = vmul.f32 %v397_v19, %v397_v19 }
 0x2c3   :  { %v384_v15 = vpop.xlane.xlu0 %383  ;;  %v396_v22 = vmul.f32 0.03125, %v387_v14 }
 0x2c4   :  { %v395_v16 = vmul.f32 0.03125, %v384_v15 }
 0x2c5   :  { %v420_v29 = vmul.f32 %v396_v22, %v396_v22 }
 0x2c6   :  { %v419_v17 = vmul.f32 %v395_v16, %v395_v16  ;;  %v405_v18 = vpop.xlane.xlu1 %404 }
 0x2c7   :  { %v415_v20 = vmul.f32 0.03125, %v405_v18  ;;  %v393_v21 = vpop.xlane.xlu0 %392  ;;  %v1658_v18 = vld [vmem:[#allocation13 + $0x28] sm:$0xff]  }
 0x2c8   :  { %v398_v30 = vmul.f32 0.03125, %v393_v21 }
 0x2c9   :  { %v423_v23 = vsub.f32 %v415_v20, %v419_v17 }
 0x2ca   :  { %v411_v24 = vpop.xlane.xlu1 %410  ;;  %v422_v37 = vmul.f32 %v398_v30, %v398_v30 }
 0x2cb   :  { %v427_v26 = vmax.f32 %v423_v23, 0.0  ;;  %v417_v27 = vmul.f32 0.03125, %v411_v24  ;;  %v408_v28 = vpop.xlane.xlu0 %407 }
 0x2cc   :  { %v416_v31 = vmul.f32 0.03125, %v408_v28 }
 0x2cd   :  { %v431_v32 = vadd.f32 1e-08, %v427_v26  ;;  %v425_v33 = vsub.f32 %v417_v27, %v421_v25 }
 0x2ce   :  { %v424_v34 = vsub.f32 %v416_v31, %v420_v29 }
 0x2cf   :  { %1673 = vrsqrt.f32 %v431_v32  ;;  %v429_v35 = vmax.f32 %v425_v33, 0.0  ;;  %v414_v36 = vpop.xlane.xlu0 %413 }
 0x2d0   :  { %v428_v38 = vmax.f32 %v424_v34, 0.0  ;;  %v418_v39 = vmul.f32 0.03125, %v414_v36 }
 0x2d1   :  { %v433_v40 = vadd.f32 1e-08, %v429_v35 }
 0x2d2   :  { %v432_v41 = vadd.f32 1e-08, %v428_v38  ;;  %v426_v42 = vsub.f32 %v418_v39, %v422_v37 }
 0x2d3   :  { %1675 = vrsqrt.f32 %v433_v40 }
 0x2d4   :  { %1677 = vrsqrt.f32 %v432_v41  ;;  %v430_v43 = vmax.f32 %v426_v42, 0.0 }
 0x2d6   :  { %v434_v44 = vadd.f32 1e-08, %v430_v43 }
 0x2d8   :  { %1679 = vrsqrt.f32 %v434_v44 }
 0x2d9   :  { %v1674_v46 = vpop.eup %1673 }
 0x2da   :  { %v445_v47 = vmul.f32 %v1674_v46, %v1397_v45 }
 0x2dc   :  { %v453_v49 = vmul.f32 %v445_v47, %v395_v16  ;;  %v449_v54 = vmul.f32 %v445_v47, %v2305_v53 }
 0x2dd   :  { %v1676_v50 = vpop.eup %1675 }
 0x2de   :  { %v1678_v52 = vpop.eup %1677  ;;  %v463_v55 = vsub.f32 %v1398_v48, %v453_v49  ;;  %v447_v56 = vmul.f32 %v1676_v50, %v1397_v45 }
 0x2df   :  { %v446_v58 = vmul.f32 %v1678_v52, %v1397_v45 }
 0x2e0   :  { %v467_v59 = vadd.f32 %v463_v55, %v449_v54  ;;  %v455_v61 = vmul.f32 %v447_v56, %v397_v19  ;;  %v451_v5 = vmul.f32 %v447_v56, %v2303_v51 }
 0x2e1   :  { %v454_v62 = vmul.f32 %v446_v58, %v396_v22  ;;  %v450_v7 = vmul.f32 %v446_v58, %v2309_v57  ;;  %v1657_v57 = vld [vmem:[#allocation13 + $0x20] sm:$0xff]  }
 0x2e2   :  { %v1680_v63 = vpop.eup %1679  ;;  %v471_v3 = vmax.f32 %v467_v59, 0.0  ;;  %v465_v6 = vsub.f32 %v1398_v48, %v455_v61  ;;  %1498 = vmatprep.subr.bf16.mxu1 %v1657_v57  ;;  %v1399_v59 = vld [vmem:[#allocation15] ss:$0 sm:$0xff] }
 0x2e3   :  { %v464_v8 = vsub.f32 %v1398_v48, %v454_v62  ;;  %v448_v9 = vmul.f32 %v1680_v63, %v1397_v45  ;;  %1499 = vmatpush3.bf16.msra.mxu1 %v1657_v57 }
 0x2e4   :  { %478 = vst.msk [vmem:[#allocation2 + $0x10] sm:$0xff] %vm201_vm0, %v471_v3  ;;  %v469_v10 = vadd.f32 %v465_v6, %v451_v5  ;;  %1500 = vmatprep.subr.bf16.mxu1 %v1658_v18 }
 0x2e5   :  { %v468_v11 = vadd.f32 %v464_v8, %v450_v7  ;;  %v456_v53 = vmul.f32 %v448_v9, %v398_v30  ;;  %v452_v15 = vmul.f32 %v448_v9, %v2315_v60 }
 0x2e6   :  { %v473_v13 = vmax.f32 %v469_v10, 0.0 }
 0x2e7   :  { %v472_v14 = vmax.f32 %v468_v11, 0.0  ;;  %v466_v16 = vsub.f32 %v1398_v48, %v456_v53  ;;  %1501 = vmatpush3.bf16.msra.mxu1 %v1658_v18  ;;  %v1659_v18 = vld [vmem:[#allocation7 + $0x30] sm:$0xff]  }
 0x2e8   :  { %480 = vst.msk [vmem:[#allocation2 + $0x30] sm:$0xff] %vm201_vm0, %v473_v13  ;;  %1506 = vmatprep.subr.bf16.mxu0 %v1659_v18 }
 0x2e9   :  { %479 = vst.msk [vmem:[#allocation2 + $0x18] sm:$0xff] %vm201_vm0, %v472_v14  ;;  %v470_v51 = vadd.f32 %v466_v16, %v452_v15  ;;  %1507 = vmatpush3.bf16.msra.mxu0 %v1659_v18 }
 0x2eb   :  { %v474_v17 = vmax.f32 %v470_v51, 0.0  ;;  %v486_v19 = vld [vmem:[#allocation2 + $0xe] sm:$0xff] }
 0x2ec   :  { %v490_v22 = vld [vmem:[#allocation2 + $0x10] sm:$0xff] }
 0x2ed   :  { %481 = vst.msk [vmem:[#allocation2 + $0x38] sm:$0xff] %vm201_vm0, %v474_v17  ;;  %v482_v37 = vld [vmem:[#allocation2 + $0xc] sm:$0xff] }
 0x2ef   :  { %v488_v23 = vld [vmem:[#allocation2 + $0x2e] sm:$0xff] }
 0x2f0   :  { %v487_v20 = vld [vmem:[#allocation2 + $0x16] sm:$0xff]  ;;  %v484_v47 = vld [vmem:[#allocation2 + $0x2c] sm:$0xff] }
 0x2f1   :  { %v1592_v60 = vpack.i.bf16 %v487_v20, %v486_v19  ;;  %v491_v21 = vld [vmem:[#allocation2 + $0x18] sm:$0xff]  ;;  %v492_v28 = vld [vmem:[#allocation2 + $0x30] sm:$0xff]  ;;  %v1661_v20 = vld [vmem:[#allocation7 + $0x40] sm:$0xff]  }
 0x2f2   :  { %v1597_v25 = vpack.i.bf16 %v491_v21, %v490_v22  ;;  %v483_v38 = vld [vmem:[#allocation2 + $0x14] sm:$0xff] }
 0x2f3   :  { %1593 = vrot.lane.b32.xlu1 %v1592_v60, %s2014_s10  ;;  %v1660_v19 = vld [vmem:[#allocation7 + $0x38] sm:$0xff]  }
 0x2f4   :  { %v489_v24 = vld [vmem:[#allocation2 + $0x36] sm:$0xff]  ;;  %1508 = vmatprep.subr.bf16.mxu0 %v1660_v19 }
 0x2f5   :  { %v1587_v26 = vpack.i.bf16 %v489_v24, %v488_v23  ;;  %v493_v27 = vld [vmem:[#allocation2 + $0x38] sm:$0xff]  ;;  %1509 = vmatpush3.bf16.msra.mxu0 %v1660_v19 }
 0x2f6   :  { %v1602_v29 = vpack.i.bf16 %v493_v27, %v492_v28  ;;  %v485_v48 = vld [vmem:[#allocation2 + $0x34] sm:$0xff]  ;;  %1510 = vmatprep.subr.bf16.mxu0 %v1661_v20 }
 0x2f7   :  { %1598 = vrot.lane.b32.xlu1 %v1597_v25, %s1996_s13  ;;  %1588 = vrot.lane.b32.xlu0 %v1587_v26, %s2014_s10 }
 0x2f9   :  { %1511 = vmatpush3.bf16.msra.mxu0 %v1661_v20 }
 0x2fb   :  { %1603 = vrot.lane.b32.xlu1 %v1602_v29, %s1996_s13 }
 0x365   :  { %v1594_v30 = vpop.permute.xlu1 %1593 }
 0x366   :  { %v1596_v31 = vunpack.i.h.bf16 %v1594_v30  ;;  %v1595_v32 = vunpack.i.l.bf16 %v1594_v30 }
 0x368   :  { %v526_v41 = vsel %vm201_vm0, %v482_v37, %v1595_v32  ;;  %v527_v42 = vsel %vm201_vm0, %v483_v38, %v1596_v31 }
 0x369   :  { %v1599_v33 = vpop.permute.xlu1 %1598  ;;  %v1589_v34 = vpop.permute.xlu0 %1588 }
 0x36a   :  { %v1601_v35 = vunpack.i.h.bf16 %v1599_v33  ;;  %v1600_v36 = vunpack.i.l.bf16 %v1599_v33  ;;  %v1591_v39 = vunpack.i.h.bf16 %v1589_v34  ;;  %v1590_v40 = vunpack.i.l.bf16 %v1589_v34 }
 0x36c   :  { %v530_v43 = vsel %vm265_vm1, %v526_v41, %v1600_v36  ;;  %v531_v44 = vsel %vm265_vm1, %v527_v42, %v1601_v35  ;;  %v528_v52 = vsel %vm201_vm0, %v484_v47, %v1590_v40  ;;  %v529_v54 = vsel %vm201_vm0, %v485_v48, %v1591_v39 }
 0x36d   :  { %v1604_v45 = vpop.permute.xlu1 %1603  ;;  %v534_v46 = vpack.c.bf16 %v531_v44, %v530_v43 }
 0x36e   :  { %v1606_v49 = vunpack.i.h.bf16 %v1604_v45  ;;  %v1605_v50 = vunpack.i.l.bf16 %v1604_v45 }
 0x36f   :  { %1502 = vmatprep.mubr.msk.bf16.mxu1 %vm326_vm2, %v534_v46 }
 0x370   :  { %v532_v55 = vsel %vm265_vm1, %v528_v52, %v1605_v50  ;;  %v533_v56 = vsel %vm265_vm1, %v529_v54, %v1606_v49  ;;  %v1408_v54 = vld [vmem:[#allocation16] ss:$0 sm:$0xff] }
 0x371   :  { %v535_v58 = vpack.c.bf16 %v533_v56, %v532_v55 }
 0x373   :  { %1503 = vmatmul.mubr.msk.bf16.vlgmr.msra.gmra.mrb[0].mxu1 %vm326_vm2, %v535_v58  ;;  %v1409_v58 = vld [vmem:[#allocation18] ss:$0 sm:$0xff] }
 0x446   :  { %v1504_v61 = vpop.f32.mrb[0].mxu1 }
 0x447   :  { %v2353_v62 = vadd.f32 %v1504_v61, %v1399_v59  ;;  %v630_v63 = vpop.f32.mrb[1].mxu1 }
 0x448   :  { %v2355_v3 = vadd.f32 %v1399_v59, %v630_v63  ;;  %v1505_v5 = vpop.f32.mrb[2].mxu1 }
 0x449   :  { %v633_v6 = vpop.f32.mrb[3].mxu1  ;;  %v651_v7 = vsel %vm201_vm0, %v2353_v62, 0.0  ;;  %v2365_v11 = vadd.f32 %v1505_v5, %v1399_v59  ;;  %v663_v13 = vmul.f32 %v2353_v62, %v2353_v62 }
 0x44a   :  { %v2359_v8 = vadd.f32 %v1399_v59, %v633_v6  ;;  %652 = vadd.xlane.f32.xlu0 %v651_v7  ;;  %v661_v10 = vmul.f32 %v2355_v3, %v2355_v3  ;;  %v645_v53 = vsel %vm201_vm0, %v2355_v3, 0.0 }
 0x44b   :  { %v654_v14 = vsel %vm201_vm0, %v2365_v11, 0.0  ;;  %v671_v16 = vsel %vm201_vm0, %v663_v13, 0.0  ;;  %v664_v57 = vmul.f32 %v2365_v11, %v2365_v11 }
 0x44c   :  { %v648_v9 = vsel %vm201_vm0, %v2359_v8, 0.0  ;;  %v665_v12 = vsel %vm201_vm0, %v661_v10, 0.0  ;;  %v662_v15 = vmul.f32 %v2359_v8, %v2359_v8 }
 0x44d   :  { %649 = vadd.xlane.f32.xlu1 %v648_v9  ;;  %v674_v17 = vsel %vm201_vm0, %v664_v57, 0.0 }
 0x44e   :  { %646 = vadd.xlane.f32.xlu0 %v645_v53  ;;  %v668_v51 = vsel %vm201_vm0, %v662_v15, 0.0 }
 0x451   :  { %666 = vadd.xlane.f32.xlu1 %v665_v12  ;;  %v738_v12 = vstv %s737_s11 }
 0x452   :  { %655 = vadd.xlane.f32.xlu0 %v654_v14 }
 0x455   :  { %672 = vadd.xlane.f32.xlu1 %v671_v16 }
 0x456   :  { %669 = vadd.xlane.f32.xlu0 %v668_v51 }
 0x45a   :  { %675 = vadd.xlane.f32.xlu0 %v674_v17 }
 0x4d7   :  { %v653_v60 = vpop.xlane.xlu0 %652 }
 0x4d8   :  { %v659_v26 = vmul.f32 0.03125, %v653_v60 }
 0x4da   :  { %v650_v21 = vpop.xlane.xlu1 %649  ;;  %v683_v32 = vmul.f32 %v659_v26, %v659_v26 }
 0x4db   :  { %v647_v22 = vpop.xlane.xlu0 %646  ;;  %v658_v29 = vmul.f32 0.03125, %v650_v21 }
 0x4dc   :  { %v657_v23 = vmul.f32 0.03125, %v647_v22 }
 0x4dd   :  { %v682_v36 = vmul.f32 %v658_v29, %v658_v29 }
 0x4de   :  { %v681_v24 = vmul.f32 %v657_v23, %v657_v23  ;;  %v667_v25 = vpop.xlane.xlu1 %666 }
 0x4df   :  { %v677_v27 = vmul.f32 0.03125, %v667_v25  ;;  %v656_v28 = vpop.xlane.xlu0 %655 }
 0x4e0   :  { %v660_v37 = vmul.f32 0.03125, %v656_v28 }
 0x4e1   :  { %v685_v30 = vsub.f32 %v677_v27, %v681_v24  ;;  %v1662_v27 = vld [vmem:[#allocation7 + $0x48] sm:$0xff]  }
 0x4e2   :  { %v673_v31 = vpop.xlane.xlu1 %672  ;;  %v684_v44 = vmul.f32 %v660_v37, %v660_v37  ;;  %1512 = vmatprep.subr.bf16.mxu0 %v1662_v27 }
 0x4e3   :  { %v689_v33 = vmax.f32 %v685_v30, 0.0  ;;  %v679_v34 = vmul.f32 0.03125, %v673_v31  ;;  %v670_v35 = vpop.xlane.xlu0 %669  ;;  %1513 = vmatpush3.bf16.msra.mxu0 %v1662_v27  ;;  %v1663_v30 = vld [vmem:[#allocation7 + $0x50] sm:$0xff]  }
 0x4e4   :  { %v678_v38 = vmul.f32 0.03125, %v670_v35  ;;  %1514 = vmatprep.subr.bf16.mxu0 %v1663_v30 }
 0x4e5   :  { %v693_v39 = vadd.f32 1e-08, %v689_v33  ;;  %v687_v40 = vsub.f32 %v679_v34, %v683_v32 }
 0x4e6   :  { %v686_v41 = vsub.f32 %v678_v38, %v682_v36 }
 0x4e7   :  { %1681 = vrsqrt.f32 %v693_v39  ;;  %v691_v42 = vmax.f32 %v687_v40, 0.0  ;;  %v676_v43 = vpop.xlane.xlu0 %675  ;;  %1515 = vmatpush3.bf16.msra.mxu0 %v1663_v30  ;;  %v1666_v30 = vld [vmem:[#allocation13 + $0x38] sm:$0xff]  }
 0x4e8   :  { %v690_v45 = vmax.f32 %v686_v41, 0.0  ;;  %v680_v46 = vmul.f32 0.03125, %v676_v43 }
 0x4e9   :  { %v695_v47 = vadd.f32 1e-08, %v691_v42 }
 0x4ea   :  { %v694_v48 = vadd.f32 1e-08, %v690_v45  ;;  %v688_v49 = vsub.f32 %v680_v46, %v684_v44  ;;  %v2409_v45 = vld [vmem:[#allocation2 + $0x8] sm:$0xff] }
 0x4eb   :  { %1683 = vrsqrt.f32 %v695_v47 }
 0x4ec   :  { %1685 = vrsqrt.f32 %v694_v48  ;;  %v692_v50 = vmax.f32 %v688_v49, 0.0 }
 0x4ee   :  { %v696_v52 = vadd.f32 1e-08, %v692_v50 }
 0x4f0   :  { %1687 = vrsqrt.f32 %v696_v52 }
 0x4f1   :  { %v1682_v55 = vpop.eup %1681 }
 0x4f2   :  { %v707_v56 = vmul.f32 %v1682_v55, %v1408_v54 }
 0x4f4   :  { %v715_v59 = vmul.f32 %v707_v56, %v657_v23  ;;  %v711_v5 = vmul.f32 %v707_v56, %v2355_v3 }
 0x4f5   :  { %v1684_v61 = vpop.eup %1683 }
 0x4f6   :  { %v1686_v63 = vpop.eup %1685  ;;  %v725_v6 = vsub.f32 %v1409_v58, %v715_v59  ;;  %v709_v7 = vmul.f32 %v1684_v61, %v1408_v54  ;;  %v2416_v59 = vld [vmem:[#allocation2 + $0x28] sm:$0xff] }
 0x4f7   :  { %v708_v9 = vmul.f32 %v1686_v63, %v1408_v54 }
 0x4f8   :  { %v729_v10 = vadd.f32 %v725_v6, %v711_v5  ;;  %v717_v53 = vmul.f32 %v709_v7, %v659_v26  ;;  %v713_v16 = vmul.f32 %v709_v7, %v2353_v62 }
 0x4f9   :  { %v716_v13 = vmul.f32 %v708_v9, %v658_v29  ;;  %v712_v57 = vmul.f32 %v708_v9, %v2359_v8 }
 0x4fa   :  { %v1688_v14 = vpop.eup %1687  ;;  %v733_v15 = vmax.f32 %v729_v10, 0.0  ;;  %v727_v51 = vsub.f32 %v1409_v58, %v717_v53 }
 0x4fb   :  { %v726_v17 = vsub.f32 %v1409_v58, %v716_v13  ;;  %v710_v18 = vmul.f32 %v1688_v14, %v1408_v54  ;;  %v1410_v13 = vld [vmem:[#allocation9 + $0x1] ss:$0 sm:$0xff] }
 0x4fc   :  { %v739_v19 = vmul.f32 %v738_v12, %v733_v15  ;;  %v731_v20 = vadd.f32 %v727_v51, %v713_v16 }
 0x4fd   :  { %v730_v60 = vadd.f32 %v726_v17, %v712_v57  ;;  %v718_v3 = vmul.f32 %v710_v18, %v660_v37  ;;  %v714_v24 = vmul.f32 %v710_v18, %v2365_v11 }
 0x4fe   :  { %v2385_v21 = vadd.f32 %v739_v19, %v2269_v0  ;;  %v735_v22 = vmax.f32 %v731_v20, 0.0 }
 0x4ff   :  { %v734_v23 = vmax.f32 %v730_v60, 0.0  ;;  %v728_v25 = vsub.f32 %v1409_v58, %v718_v3 }
 0x500   :  { %753 = vst.msk [vmem:[#allocation2 + $0x10] sm:$0xff] %vm201_vm0, %v2385_v21  ;;  %v741_v62 = vmul.f32 %v738_v12, %v735_v22 }
 0x501   :  { %v740_v26 = vmul.f32 %v738_v12, %v734_v23  ;;  %v732_v8 = vadd.f32 %v728_v25, %v714_v24 }
 0x502   :  { %v2391_v28 = vadd.f32 %v741_v62, %v2273_v2 }
 0x503   :  { %v2394_v29 = vadd.f32 %v740_v26, %v2271_v1  ;;  %v736_v0 = vmax.f32 %v732_v8, 0.0  ;;  %v1664_v1 = vld [vmem:[#allocation7 + $0x58] sm:$0xff]  }
 0x504   :  { %755 = vst.msk [vmem:[#allocation2 + $0x30] sm:$0xff] %vm201_vm0, %v2391_v28  ;;  %1516 = vmatprep.subr.bf16.mxu0 %v1664_v1 }
 0x505   :  { %754 = vst.msk [vmem:[#allocation2 + $0x18] sm:$0xff] %vm201_vm0, %v2394_v29  ;;  %v742_v11 = vmul.f32 %v738_v12, %v736_v0  ;;  %1517 = vmatpush3.bf16.msra.mxu0 %v1664_v1  ;;  %v1667_v1 = vld [vmem:[#allocation13 + $0x40] sm:$0xff]  }
 0x507   :  { %v2401_v31 = vadd.f32 %v742_v11, %v2283_v4  ;;  %v761_v2 = vld [vmem:[#allocation2 + $0xc] sm:$0xff]  ;;  %v1665_v11 = vld [vmem:[#allocation13 + $0x30] sm:$0xff]  }
 0x508   :  { %v758_v35 = vld [vmem:[#allocation2 + $0x10] sm:$0xff]  ;;  %1522 = vmatprep.subr.bf16.mxu1 %v1665_v11 }
 0x509   :  { %756 = vst.msk [vmem:[#allocation2 + $0x38] sm:$0xff] %vm201_vm0, %v2401_v31  ;;  %1523 = vmatpush3.bf16.msra.mxu1 %v1665_v11 }
 0x50a   :  { %1524 = vmatprep.subr.bf16.mxu1 %v1666_v30 }
 0x50b   :  { %v763_v36 = vld [vmem:[#allocation2 + $0x2c] sm:$0xff] }
 0x50c   :  { %v762_v32 = vld [vmem:[#allocation2 + $0x14] sm:$0xff] }
 0x50d   :  { %v1612_v33 = vpack.i.bf16 %v762_v32, %v761_v2  ;;  %v765_v34 = vld [vmem:[#allocation2 + $0x18] sm:$0xff]  ;;  %v760_v40 = vld [vmem:[#allocation2 + $0x30] sm:$0xff]  ;;  %1525 = vmatpush3.bf16.msra.mxu1 %v1666_v30 }
 0x50e   :  { %v1617_v38 = vpack.i.bf16 %v765_v34, %v758_v35  ;;  %1526 = vmatprep.subr.bf16.mxu1 %v1667_v1 }
 0x50f   :  { %1613 = vrot.lane.b32.xlu1 %v1612_v33, %s2014_s10 }
 0x510   :  { %v764_v37 = vld [vmem:[#allocation2 + $0x34] sm:$0xff] }
 0x511   :  { %v1607_v4 = vpack.i.bf16 %v764_v37, %v763_v36  ;;  %v766_v39 = vld [vmem:[#allocation2 + $0x38] sm:$0xff]  ;;  %1527 = vmatpush3.bf16.msra.mxu1 %v1667_v1 }
 0x512   :  { %v1622_v41 = vpack.i.bf16 %v766_v39, %v760_v40 }
 0x513   :  { %1618 = vrot.lane.b32.xlu1 %v1617_v38, %s1996_s13  ;;  %1608 = vrot.lane.b32.xlu0 %v1607_v4, %s2014_s10 }
 0x517   :  { %1623 = vrot.lane.b32.xlu1 %v1622_v41, %s1996_s13 }
 0x581   :  { %v1614_v42 = vpop.permute.xlu1 %1613 }
 0x582   :  { %v1616_v43 = vunpack.i.h.bf16 %v1614_v42  ;;  %v1615_v44 = vunpack.i.l.bf16 %v1614_v42 }
 0x584   :  { %v800_v50 = vsel %vm201_vm0, %v758_v35, %v1616_v43  ;;  %v799_v52 = vsel %vm201_vm0, %v2409_v45, %v1615_v44 }
 0x585   :  { %v1619_v46 = vpop.permute.xlu1 %1618  ;;  %v1609_v47 = vpop.permute.xlu0 %1608 }
 0x586   :  { %v1621_v48 = vunpack.i.h.bf16 %v1619_v46  ;;  %v1620_v49 = vunpack.i.l.bf16 %v1619_v46  ;;  %v1611_v54 = vunpack.i.h.bf16 %v1609_v47  ;;  %v1610_v55 = vunpack.i.l.bf16 %v1609_v47 }
 0x588   :  { %v803_v56 = vsel %vm265_vm1, %v799_v52, %v1620_v49  ;;  %v804_v58 = vsel %vm265_vm1, %v800_v50, %v1621_v48  ;;  %v802_v7 = vsel %vm201_vm0, %v760_v40, %v1611_v54  ;;  %v801_v9 = vsel %vm201_vm0, %v2416_v59, %v1610_v55 }
 0x589   :  { %v807_v61 = vpack.c.bf16 %v804_v58, %v803_v56  ;;  %v1624_v63 = vpop.permute.xlu1 %1623 }
 0x58a   :  { %v1626_v5 = vunpack.i.h.bf16 %v1624_v63  ;;  %v1625_v6 = vunpack.i.l.bf16 %v1624_v63 }
 0x58b   :  { %1518 = vmatprep.mubr.msk.bf16.mxu0 %vm326_vm2, %v807_v61 }
 0x58c   :  { %v805_v10 = vsel %vm265_vm1, %v801_v9, %v1625_v6  ;;  %v806_v53 = vsel %vm265_vm1, %v802_v7, %v1626_v5 }
 0x58d   :  { %v808_v12 = vpack.c.bf16 %v806_v53, %v805_v10  ;;  %v1419_v53 = vld [vmem:[#allocation10 + $0x1] ss:$0 sm:$0xff] }
 0x58f   :  { %1519 = vmatmul.mubr.msk.bf16.vlgmr.msra.gmra.mrb[4].mxu0 %vm326_vm2, %v808_v12 }
 0x662   :  { %v1520_v14 = vpop.f32.mrb[4].mxu0 }
 0x663   :  { %v2425_v15 = vadd.f32 %v1520_v14, %v1410_v13  ;;  %v904_v16 = vpop.f32.mrb[5].mxu0  ;;  %v1420_v14 = vld [vmem:[#allocation12 + $0x1] ss:$0 sm:$0xff] }
 0x664   :  { %v2427_v51 = vadd.f32 %v1410_v13, %v904_v16  ;;  %v1521_v57 = vpop.f32.mrb[6].mxu0 }
 0x665   :  { %v907_v17 = vpop.f32.mrb[7].mxu0  ;;  %v925_v18 = vsel %vm201_vm0, %v2425_v15, 0.0  ;;  %v2437_v3 = vadd.f32 %v1521_v57, %v1410_v13  ;;  %v937_v24 = vmul.f32 %v2425_v15, %v2425_v15 }
 0x666   :  { %v2431_v19 = vadd.f32 %v1410_v13, %v907_v17  ;;  %926 = vadd.xlane.f32.xlu0 %v925_v18  ;;  %v935_v60 = vmul.f32 %v2427_v51, %v2427_v51  ;;  %v919_v22 = vsel %vm201_vm0, %v2427_v51, 0.0 }
 0x667   :  { %v928_v25 = vsel %vm201_vm0, %v2437_v3, 0.0  ;;  %v945_v26 = vsel %vm201_vm0, %v937_v24, 0.0  ;;  %v938_v27 = vmul.f32 %v2437_v3, %v2437_v3 }
 0x668   :  { %v922_v20 = vsel %vm201_vm0, %v2431_v19, 0.0  ;;  %v939_v23 = vsel %vm201_vm0, %v935_v60, 0.0  ;;  %v936_v62 = vmul.f32 %v2431_v19, %v2431_v19 }
 0x669   :  { %923 = vadd.xlane.f32.xlu1 %v922_v20  ;;  %v948_v0 = vsel %vm201_vm0, %v938_v27, 0.0 }
 0x66a   :  { %920 = vadd.xlane.f32.xlu0 %v919_v22  ;;  %v942_v8 = vsel %vm201_vm0, %v936_v62, 0.0  ;;  %v1668_v62 = vld [vmem:[#allocation13 + $0x48] sm:$0xff]  }
 0x66b   :  { %1528 = vmatprep.subr.bf16.mxu1 %v1668_v62 }
 0x66c   :  { %1529 = vmatpush3.bf16.msra.mxu1 %v1668_v62 }
 0x66d   :  { %940 = vadd.xlane.f32.xlu1 %v939_v23 }
 0x66e   :  { %929 = vadd.xlane.f32.xlu0 %v928_v25 }
 0x671   :  { %946 = vadd.xlane.f32.xlu1 %v945_v26 }
 0x672   :  { %943 = vadd.xlane.f32.xlu0 %v942_v8 }
 0x676   :  { %949 = vadd.xlane.f32.xlu0 %v948_v0 }
 0x6f3   :  { %v927_v2 = vpop.xlane.xlu0 %926 }
 0x6f4   :  { %v933_v37 = vmul.f32 0.03125, %v927_v2 }
 0x6f6   :  { %v924_v32 = vpop.xlane.xlu1 %923  ;;  %v957_v42 = vmul.f32 %v933_v37, %v933_v37 }
 0x6f7   :  { %v921_v33 = vpop.xlane.xlu0 %920  ;;  %v932_v39 = vmul.f32 0.03125, %v924_v32 }
 0x6f8   :  { %v931_v34 = vmul.f32 0.03125, %v921_v33  ;;  %v1669_v33 = vld [vmem:[#allocation13 + $0x50] sm:$0xff]  }
 0x6f9   :  { %v956_v47 = vmul.f32 %v932_v39, %v932_v39  ;;  %1530 = vmatprep.subr.bf16.mxu1 %v1669_v33 }
 0x6fa   :  { %v955_v35 = vmul.f32 %v931_v34, %v931_v34  ;;  %v941_v36 = vpop.xlane.xlu1 %940  ;;  %1531 = vmatpush3.bf16.msra.mxu1 %v1669_v33 }
 0x6fb   :  { %v951_v38 = vmul.f32 0.03125, %v941_v36  ;;  %v930_v4 = vpop.xlane.xlu0 %929 }
 0x6fc   :  { %v934_v48 = vmul.f32 0.03125, %v930_v4 }
 0x6fd   :  { %v959_v40 = vsub.f32 %v951_v38, %v955_v35 }
 0x6fe   :  { %v947_v41 = vpop.xlane.xlu1 %946  ;;  %v958_v58 = vmul.f32 %v934_v48, %v934_v48 }
 0x6ff   :  { %v963_v43 = vmax.f32 %v959_v40, 0.0  ;;  %v953_v44 = vmul.f32 0.03125, %v947_v41  ;;  %v944_v46 = vpop.xlane.xlu0 %943 }
 0x700   :  { %v952_v49 = vmul.f32 0.03125, %v944_v46 }
 0x701   :  { %v967_v50 = vadd.f32 1e-08, %v963_v43  ;;  %v961_v52 = vsub.f32 %v953_v44, %v957_v42 }
 0x702   :  { %v960_v54 = vsub.f32 %v952_v49, %v956_v47  ;;  %v1021_v49 = vld [vmem:[#allocation2] sm:$0xff] }
 0x703   :  { %1689 = vrsqrt.f32 %v967_v50  ;;  %v965_v55 = vmax.f32 %v961_v52, 0.0  ;;  %v950_v56 = vpop.xlane.xlu0 %949 }
 0x704   :  { %v964_v61 = vmax.f32 %v960_v54, 0.0  ;;  %v954_v63 = vmul.f32 0.03125, %v950_v56 }
 0x705   :  { %v969_v5 = vadd.f32 1e-08, %v965_v55 }
 0x706   :  { %v968_v6 = vadd.f32 1e-08, %v964_v61  ;;  %v962_v7 = vsub.f32 %v954_v63, %v958_v58 }
 0x707   :  { %1691 = vrsqrt.f32 %v969_v5  ;;  %v1023_v5 = vld [vmem:[#allocation2 + $0x20] sm:$0xff] }
 0x708   :  { %1693 = vrsqrt.f32 %v968_v6  ;;  %v966_v9 = vmax.f32 %v962_v7, 0.0 }
 0x70a   :  { %v970_v10 = vadd.f32 1e-08, %v966_v9 }
 0x70c   :  { %1695 = vrsqrt.f32 %v970_v10 }
 0x70d   :  { %v1690_v12 = vpop.eup %1689 }
 0x70e   :  { %v981_v13 = vmul.f32 %v1690_v12, %v1419_v53 }
 0x710   :  { %v989_v16 = vmul.f32 %v981_v13, %v931_v34  ;;  %v985_v18 = vmul.f32 %v981_v13, %v2427_v51 }
 0x711   :  { %v1692_v57 = vpop.eup %1691 }
 0x712   :  { %v1694_v17 = vpop.eup %1693  ;;  %v999_v20 = vsub.f32 %v1420_v14, %v989_v16  ;;  %v983_v60 = vmul.f32 %v1692_v57, %v1419_v53 }
 0x713   :  { %v982_v22 = vmul.f32 %v1694_v17, %v1419_v53  ;;  %v1421_v17 = vld [vmem:[#allocation15 + $0x1] ss:$0 sm:$0xff] }
 0x714   :  { %v1003_v23 = vadd.f32 %v999_v20, %v985_v18  ;;  %v991_v24 = vmul.f32 %v983_v60, %v933_v37  ;;  %v987_v27 = vmul.f32 %v983_v60, %v2425_v15 }
 0x715   :  { %v990_v25 = vmul.f32 %v982_v22, %v932_v39  ;;  %v986_v11 = vmul.f32 %v982_v22, %v2431_v19  ;;  %v1670_v19 = vld [vmem:[#allocation13 + $0x58] sm:$0xff]  }
 0x716   :  { %v1696_v26 = vpop.eup %1695  ;;  %v1007_v8 = vmax.f32 %v1003_v23, 0.0  ;;  %v1001_v0 = vsub.f32 %v1420_v14, %v991_v24  ;;  %1532 = vmatprep.subr.bf16.mxu1 %v1670_v19 }
 0x717   :  { %v1000_v30 = vsub.f32 %v1420_v14, %v990_v25  ;;  %v984_v1 = vmul.f32 %v1696_v26, %v1419_v53  ;;  %1533 = vmatpush3.bf16.msra.mxu1 %v1670_v19 }
 0x718   :  { %1017 = vst.msk [vmem:[#allocation2 + $0x10] sm:$0xff] %vm201_vm0, %v1007_v8  ;;  %v1005_v51 = vadd.f32 %v1001_v0, %v987_v27 }
 0x719   :  { %v1004_v2 = vadd.f32 %v1000_v30, %v986_v11  ;;  %v992_v32 = vmul.f32 %v984_v1, %v934_v48  ;;  %v988_v36 = vmul.f32 %v984_v1, %v2437_v3 }
 0x71a   :  { %v1009_v34 = vmax.f32 %v1005_v51, 0.0 }
 0x71b   :  { %v1008_v35 = vmax.f32 %v1004_v2, 0.0  ;;  %v1002_v37 = vsub.f32 %v1420_v14, %v992_v32 }
 0x71c   :  { %1019 = vst.msk [vmem:[#allocation2 + $0x30] sm:$0xff] %vm201_vm0, %v1009_v34  ;;  %v1671_v34 = vld [vmem:[#allocation19] sm:$0xff]  }
 0x71d   :  { %1018 = vst.msk [vmem:[#allocation2 + $0x18] sm:$0xff] %vm201_vm0, %v1008_v35  ;;  %v1006_v15 = vadd.f32 %v1002_v37, %v988_v36  ;;  %v1672_v35 = vld [vmem:[#allocation19 + $0x8] sm:$0xff]   ;;  %1538 = vmatprep.subr.bf16.mxu0 %v1671_v34 }
 0x71e   :  { %1539 = vmatpush3.bf16.msra.mxu0 %v1671_v34 }
 0x71f   :  { %v1010_v38 = vmax.f32 %v1006_v15, 0.0  ;;  %v1025_v4 = vld [vmem:[#allocation2 + $0x10] sm:$0xff]  ;;  %1540 = vmatprep.subr.bf16.mxu0 %v1672_v35 }
 0x720   :  { %v1632_v39 = vpack.i.bf16 %v1025_v4, %v2409_v45 }
 0x721   :  { %1020 = vst.msk [vmem:[#allocation2 + $0x38] sm:$0xff] %vm201_vm0, %v1010_v38 }
 0x722   :  { %1633 = vrot.lane.b32.xlu1 %v1632_v39, %s2014_s10  ;;  %1541 = vmatpush3.bf16.msra.mxu0 %v1672_v35 }
 0x723   :  { %v1026_v3 = vld [vmem:[#allocation2 + $0x30] sm:$0xff] }
 0x724   :  { %v1627_v40 = vpack.i.bf16 %v1026_v3, %v2416_v59  ;;  %v1027_v41 = vld [vmem:[#allocation2 + $0x18] sm:$0xff] }
 0x725   :  { %v1637_v42 = vpack.i.bf16 %v1027_v41, %v1025_v4 }
 0x726   :  { %1628 = vrot.lane.b32.xlu0 %v1627_v40, %s2014_s10 }
 0x727   :  { %1638 = vrot.lane.b32.xlu1 %v1637_v42, %s1996_s13 }
 0x728   :  { %v1028_v43 = vld [vmem:[#allocation2 + $0x38] sm:$0xff] }
 0x729   :  { %v1642_v44 = vpack.i.bf16 %v1028_v43, %v1026_v3 }
 0x72b   :  { %1643 = vrot.lane.b32.xlu1 %v1642_v44, %s1996_s13  ;;  %s1432_s13 = sld [smem:[#allocation22 + $0x1]] }
 0x794   :  { %v1634_v46 = vpop.permute.xlu1 %1633 }
 0x795   :  { %v1636_v47 = vunpack.i.h.bf16 %v1634_v46  ;;  %v1635_v48 = vunpack.i.l.bf16 %v1634_v46 }
 0x797   :  { %v1060_v56 = vsel %vm201_vm0, %v2409_v45, %v1636_v47  ;;  %v1059_v58 = vsel %vm201_vm0, %v1021_v49, %v1635_v48 }
 0x798   :  { %v1629_v50 = vpop.permute.xlu0 %1628 }
 0x799   :  { %v1639_v52 = vpop.permute.xlu1 %1638  ;;  %v1631_v61 = vunpack.i.h.bf16 %v1629_v50  ;;  %v1630_v63 = vunpack.i.l.bf16 %v1629_v50 }
 0x79a   :  { %v1641_v54 = vunpack.i.h.bf16 %v1639_v52  ;;  %v1640_v55 = vunpack.i.l.bf16 %v1639_v52 }
 0x79b   :  { %v1062_v13 = vsel %vm201_vm0, %v2416_v59, %v1631_v61  ;;  %v1061_v14 = vsel %vm201_vm0, %v1023_v5, %v1630_v63 }
 0x79c   :  { %v1064_v6 = vsel %vm265_vm1, %v1060_v56, %v1641_v54  ;;  %v1063_v7 = vsel %vm265_vm1, %v1059_v58, %v1640_v55 }
 0x79d   :  { %v1067_v9 = vpack.c.bf16 %v1064_v6, %v1063_v7  ;;  %v1644_v10 = vpop.permute.xlu1 %1643 }
 0x79e   :  { %v1646_v53 = vunpack.i.h.bf16 %v1644_v10  ;;  %v1645_v12 = vunpack.i.l.bf16 %v1644_v10 }
 0x79f   :  { %1534 = vmatprep.mubr.msk.bf16.mxu1 %vm326_vm2, %v1067_v9 }
 0x7a0   :  { %v1065_v45 = vsel %vm265_vm1, %v1061_v14, %v1645_v12  ;;  %v1066_v16 = vsel %vm265_vm1, %v1062_v13, %v1646_v53  ;;  %v1430_v13 = vld [vmem:[#allocation16 + $0x1] ss:$0 sm:$0xff] }
 0x7a1   :  { %v1068_v57 = vpack.c.bf16 %v1066_v16, %v1065_v45  ;;  %v1431_v16 = vld [vmem:[#allocation18 + $0x1] ss:$0 sm:$0xff] }
 0x7a3   :  { %1535 = vmatmul.mubr.msk.bf16.vlgmr.msra.gmra.mrb[4].mxu1 %vm326_vm2, %v1068_v57 }
 0x876   :  { %v1536_v18 = vpop.f32.mrb[4].mxu1 }
 0x877   :  { %v2479_v20 = vadd.f32 %v1536_v18, %v1421_v17  ;;  %v1164_v60 = vpop.f32.mrb[5].mxu1 }
 0x878   :  { %v2481_v22 = vadd.f32 %v1421_v17, %v1164_v60  ;;  %v1537_v23 = vpop.f32.mrb[6].mxu1 }
 0x879   :  { %v1167_v59 = vpop.f32.mrb[7].mxu1  ;;  %v1185_v24 = vsel %vm201_vm0, %v2479_v20, 0.0  ;;  %v2491_v8 = vadd.f32 %v1537_v23, %v1421_v17  ;;  %v1197_v11 = vmul.f32 %v2479_v20, %v2479_v20 }
 0x87a   :  { %v2485_v25 = vadd.f32 %v1421_v17, %v1167_v59  ;;  %1186 = vadd.xlane.f32.xlu0 %v1185_v24  ;;  %v1195_v26 = vmul.f32 %v2481_v22, %v2481_v22  ;;  %v1179_v27 = vsel %vm201_vm0, %v2481_v22, 0.0 }
 0x87b   :  { %v1188_v30 = vsel %vm201_vm0, %v2491_v8, 0.0  ;;  %v1205_v51 = vsel %vm201_vm0, %v1197_v11, 0.0  ;;  %v1198_v32 = vmul.f32 %v2491_v8, %v2491_v8 }
 0x87c   :  { %v1182_v62 = vsel %vm201_vm0, %v2485_v25, 0.0  ;;  %v1199_v0 = vsel %vm201_vm0, %v1195_v26, 0.0  ;;  %v1196_v1 = vmul.f32 %v2485_v25, %v2485_v25 }
 0x87d   :  { %1183 = vadd.xlane.f32.xlu1 %v1182_v62  ;;  %v1208_v33 = vsel %vm201_vm0, %v1198_v32, 0.0 }
 0x87e   :  { %1180 = vadd.xlane.f32.xlu0 %v1179_v27  ;;  %v1202_v2 = vsel %vm201_vm0, %v1196_v1, 0.0 }
 0x881   :  { %1200 = vadd.xlane.f32.xlu1 %v1199_v0 }
 0x882   :  { %1189 = vadd.xlane.f32.xlu0 %v1188_v30 }
 0x885   :  { %1206 = vadd.xlane.f32.xlu1 %v1205_v51 }
 0x886   :  { %1203 = vadd.xlane.f32.xlu0 %v1202_v2 }
 0x88a   :  { %1209 = vadd.xlane.f32.xlu0 %v1208_v33  ;;  %v1272_v33 = vstv %s1432_s13 }
 0x907   :  { %v1187_v36 = vpop.xlane.xlu0 %1186 }
 0x908   :  { %v1193_v39 = vmul.f32 0.03125, %v1187_v36 }
 0x90a   :  { %v1184_v37 = vpop.xlane.xlu1 %1183  ;;  %v1217_v44 = vmul.f32 %v1193_v39, %v1193_v39 }
 0x90b   :  { %v1181_v15 = vpop.xlane.xlu0 %1180  ;;  %v1192_v41 = vmul.f32 0.03125, %v1184_v37 }
 0x90c   :  { %v1191_v19 = vmul.f32 0.03125, %v1181_v15 }
 0x90d   :  { %v1216_v49 = vmul.f32 %v1192_v41, %v1192_v41 }
 0x90e   :  { %v1215_v38 = vmul.f32 %v1191_v19, %v1191_v19  ;;  %v1201_v4 = vpop.xlane.xlu1 %1200 }
 0x90f   :  { %v1211_v3 = vmul.f32 0.03125, %v1201_v4  ;;  %v1190_v40 = vpop.xlane.xlu0 %1189 }
 0x910   :  { %v1194_v50 = vmul.f32 0.03125, %v1190_v40 }
 0x911   :  { %v1219_v42 = vsub.f32 %v1211_v3, %v1215_v38 }
 0x912   :  { %v1207_v43 = vpop.xlane.xlu1 %1206  ;;  %v1218_v63 = vmul.f32 %v1194_v50, %v1194_v50 }
 0x913   :  { %v1223_v46 = vmax.f32 %v1219_v42, 0.0  ;;  %v1213_v47 = vmul.f32 0.03125, %v1207_v43  ;;  %v1204_v48 = vpop.xlane.xlu0 %1203 }
 0x914   :  { %v1212_v52 = vmul.f32 0.03125, %v1204_v48 }
 0x915   :  { %v1227_v54 = vadd.f32 1e-08, %v1223_v46  ;;  %v1221_v55 = vsub.f32 %v1213_v47, %v1217_v44  ;;  %v1433_v46 = vld [vmem:[#allocation21] ss:$0 sm:$0xff] }
 0x916   :  { %v1220_v56 = vsub.f32 %v1212_v52, %v1216_v49 }
 0x917   :  { %1697 = vrsqrt.f32 %v1227_v54  ;;  %v1225_v58 = vmax.f32 %v1221_v55, 0.0  ;;  %v1210_v61 = vpop.xlane.xlu0 %1209 }
 0x918   :  { %v1224_v5 = vmax.f32 %v1220_v56, 0.0  ;;  %v1214_v6 = vmul.f32 0.03125, %v1210_v61 }
 0x919   :  { %v1229_v7 = vadd.f32 1e-08, %v1225_v58 }
 0x91a   :  { %v1228_v9 = vadd.f32 1e-08, %v1224_v5  ;;  %v1222_v10 = vsub.f32 %v1214_v6, %v1218_v63 }
 0x91b   :  { %1699 = vrsqrt.f32 %v1229_v7 }
 0x91c   :  { %1701 = vrsqrt.f32 %v1228_v9  ;;  %v1226_v53 = vmax.f32 %v1222_v10, 0.0 }
 0x91e   :  { %v1230_v12 = vadd.f32 1e-08, %v1226_v53 }
 0x920   :  { %1703 = vrsqrt.f32 %v1230_v12 }
 0x921   :  { %v1698_v14 = vpop.eup %1697 }
 0x922   :  { %v1241_v45 = vmul.f32 %v1698_v14, %v1430_v13 }
 0x924   :  { %v1249_v57 = vmul.f32 %v1241_v45, %v1191_v19  ;;  %v1245_v23 = vmul.f32 %v1241_v45, %v2481_v22 }
 0x925   :  { %v1700_v17 = vpop.eup %1699 }
 0x926   :  { %v1702_v18 = vpop.eup %1701  ;;  %v1243_v60 = vmul.f32 %v1700_v17, %v1430_v13  ;;  %v1259_v59 = vsub.f32 %v1431_v16, %v1249_v57 }
 0x927   :  { %v1242_v24 = vmul.f32 %v1702_v18, %v1430_v13 }
 0x928   :  { %v1251_v62 = vmul.f32 %v1243_v60, %v1193_v39  ;;  %v1263_v26 = vadd.f32 %v1259_v59, %v1245_v23  ;;  %v1247_v11 = vmul.f32 %v1243_v60, %v2479_v20 }
 0x929   :  { %v1250_v27 = vmul.f32 %v1242_v24, %v1192_v41  ;;  %v1246_v2 = vmul.f32 %v1242_v24, %v2485_v25 }
 0x92a   :  { %v1704_v0 = vpop.eup %1703  ;;  %v1261_v30 = vsub.f32 %v1431_v16, %v1251_v62  ;;  %v1267_v1 = vmax.f32 %v1263_v26, 0.0 }
 0x92b   :  { %v1244_v51 = vmul.f32 %v1704_v0, %v1430_v13  ;;  %v1260_v32 = vsub.f32 %v1431_v16, %v1250_v27 }
 0x92c   :  { %v1265_v34 = vadd.f32 %v1261_v30, %v1247_v11  ;;  %v1273_v37 = vmul.f32 %v1272_v33, %v1267_v1 }
 0x92d   :  { %v1252_v35 = vmul.f32 %v1244_v51, %v1194_v50  ;;  %v1264_v36 = vadd.f32 %v1260_v32, %v1246_v2  ;;  %v1248_v22 = vmul.f32 %v1244_v51, %v2491_v8 }
 0x92e   :  { %v1269_v38 = vmax.f32 %v1265_v34, 0.0  ;;  %v1277_v20 = vadd.f32 %v1273_v37, %v2385_v21 }
 0x92f   :  { %v1262_v15 = vsub.f32 %v1431_v16, %v1252_v35  ;;  %v1268_v19 = vmax.f32 %v1264_v36, 0.0 }
 0x930   :  { %v1275_v41 = vmul.f32 %v1272_v33, %v1269_v38 }
 0x931   :  { %v1266_v4 = vadd.f32 %v1262_v15, %v1248_v22  ;;  %v1274_v39 = vmul.f32 %v1272_v33, %v1268_v19 }
 0x932   :  { %v1279_v43 = vadd.f32 %v1275_v41, %v2391_v28 }
 0x933   :  { %v1278_v3 = vadd.f32 %v1274_v39, %v2394_v29  ;;  %v1270_v40 = vmax.f32 %v1266_v4, 0.0 }
 0x935   :  { %v1281_v25 = vpack.c.bf16 %v1278_v3, %v1277_v20  ;;  %v1276_v42 = vmul.f32 %v1272_v33, %v1270_v40 }
 0x937   :  { %1542 = vmatprep.mubr.msk.bf16.mxu0 %vm201_vm0, %v1281_v25  ;;  %v1280_v44 = vadd.f32 %v1276_v42, %v2401_v31 }
 0x939   :  { %v1282_v8 = vpack.c.bf16 %v1280_v44, %v1279_v43 }
 0x93b   :  { %1543 = vmatmul.mubr.msk.bf16.vlgmr.msra.gmra.mrb[8].mxu0 %vm201_vm0, %v1282_v8 }
 0xa0e   :  { %v1544_v47 = vpop.f32.mrb[8].mxu0 }
 0xa0f   :  { %v1355_v48 = vadd.f32 %v1544_v47, %v1433_v46  ;;  %v1346_v49 = vpop.f32.mrb[9].mxu0 }
 0xa10   :  { %v1347_v21 = vadd.f32 %v1433_v46, %v1346_v49  ;;  %v1545_v29 = vpop.f32.mrb[10].mxu0 }
 0xa11   :  { %1363 = vst [vmem:[#allocation23 + $0x10] sm:$0xff] %v1355_v48  ;;  %v1358_v50 = vadd.f32 %v1545_v29, %v1433_v46  ;;  %v1349_v52 = vpop.f32.mrb[11].mxu0 }
 0xa12   :  { %1361 = vst [vmem:[#allocation23] sm:$0xff] %v1347_v21  ;;  %v1350_v54 = vadd.f32 %v1433_v46, %v1349_v52 }
 0xa13   :  { %1364 = vst [vmem:[#allocation23 + $0x18] sm:$0xff] %v1358_v50 }
 0xa14   :  { %1362 = vst [vmem:[#allocation23 + $0x8] sm:$0xff] %v1350_v54 }
 0xa15   :  { %1968 = shalt.err (!%p1965_p11)
}
 0xa16   :  { %s1969_s0 = scalar_lea.hbm %s2544_s12, 512 }
 0xa17   :  { %p1970_p12 = scmp.ne.s32.totalorder %s2544_s12, %s1969_s0  ;;  %p1973_p13 = scmp.lt.u32.totalorder %s1969_s0, %s2544_s12 }
 0xa19   :  { %p1975_p0 = pnand %p1973_p13, %p1970_p12 }
 0xa1b   :  { %1978 = shalt.err (!%p1975_p0)
}
 0xa1c   :  { %1376 = dma.vmem_to_hbm [thread:$0]  %s1371_s19, 512, %s2544_s12, [#allocation5], %s2005_s9, %s2005_s9, %s2006_s14  }
 0xa1d   :  { %1993 = dma.done.wait [#allocation5], 512  }
 0xa1e   :  { %1994 = vsyncadd [#allocation5], 4294966784 }
 0xa1f   :  { %1380 = vsyncpa [#allocation4], 1 }
 0xa20   :  { %1381 = vsyncpa [#allocation8], 1 }
 0xa21   :  { %1382 = vsyncpa [#allocation11], 1 }
 0xa22   :  { %1383 = vsyncpa [#allocation14], 1 }
 0xa23   :  { %1384 = vsyncpa [#allocation17], 1 }
 0xa24   :  { %1385 = vsyncpa [#allocation20], 1 }
 0xa25   :  { %1386 = vsyncpa [#allocation5], 1 }
 0xa26   :  { %1387 = vsyncpa [#allocation6], 1 }

</bundles_post_ra>
